<compile_context>
chip_gen: v6e
topology: v6e:2x2x1
jax: 0.10.0
libtpu: 0.0.40
codegen_flags: <defaults>
</compile_context>

<pallas_src>
import functools

import jax
import jax.numpy as jnp
import numpy as np
from jax import lax
from jax.experimental import pallas as pl
from jax.experimental.pallas import tpu as pltpu

EPS = 1e-5
_VMEM_LIMIT = 32 * 1024 * 1024   # explicit scoped-VMEM limit, safe on v5e/v6e/v7x


# ----------------------------------------------------------------------------
# Pallas kernels
# ----------------------------------------------------------------------------
def _layernorm(y, g, b):
    mu = jnp.mean(y, axis=-1, keepdims=True)
    var = jnp.mean((y - mu) ** 2, axis=-1, keepdims=True)
    return (y - mu) * lax.rsqrt(var + EPS) * g + b


def transformer_stack_kernel(x_ref, wqkv_ref, wu_ref, bu_ref, g1_ref, be1_ref,
                             w1_ref, bf1_ref, w2_ref, bf2_ref, g2_ref, be2_ref,
                             o_ref, dist_ref, *, heads, dist_points):
    """Grid = (batch, depth).  o_ref holds the VMEM-resident residual stream."""
    d = pl.program_id(1)

    # depth == 0: seed the resident accumulator with the embedded input.
    @pl.when(d == 0)
    def _():
        o_ref[...] = x_ref[...]

    x0 = o_ref[0]                                   # (T, E) f32 residual stream
    t, e = x0.shape
    s = e // heads
    xb = x0.astype(jnp.bfloat16)

    # ---- attention: fused QKV, one K=E matmul (q/k scale folded into weight)
    qkv = jnp.dot(xb, wqkv_ref[0], preferred_element_type=jnp.float32)  # (T,3E)
    q = qkv[:, :e]
    k = qkv[:, e:2 * e]
    v = qkv[:, 2 * e:]

    # Head-batched layout (H, T, s).  At production sizes s is a multiple of
    # 128 so these splits are lane-aligned; all-head attention then runs as two
    # batched MXU ops instead of 2*heads small ones.
    def split_heads(a):
        return jnp.stack([a[:, hh * s:(hh + 1) * s] for hh in range(heads)]
                         ).astype(jnp.bfloat16)

    qh, kh, vh = split_heads(q), split_heads(k), split_heads(v)

    scores = jnp.einsum('hqd,hkd->hqk', qh, kh,
                        preferred_element_type=jnp.float32)             # (H,T,T)
    row = lax.broadcasted_iota(jnp.int32, (t, t), 0)
    col = lax.broadcasted_iota(jnp.int32, (t, t), 1)
    scores = jnp.where((col > row)[None, :, :], -1e30, scores)          # causal
    scores = scores - jnp.max(scores, axis=-1, keepdims=True)
    p = jnp.exp(scores)
    p = p * pl.reciprocal(jnp.sum(p, axis=-1, keepdims=True), approx=True)

    ctx = jnp.einsum('hqk,hkd->hqd', p.astype(jnp.bfloat16), vh,
                     preferred_element_type=jnp.float32)                # (H,T,s)
    ctx2d = jnp.concatenate([ctx[hh] for hh in range(heads)], axis=1)   # (T,E)

    # Single K=E unify matmul.
    attended = jnp.dot(ctx2d.astype(jnp.bfloat16), wu_ref[0],
                       preferred_element_type=jnp.float32) + bu_ref[0]

    # ---- layernorm / feed-forward (LN + softmax math stays f32)
    y = _layernorm(attended + x0, g1_ref[0], be1_ref[0])
    h = jnp.maximum(jnp.dot(y.astype(jnp.bfloat16), w1_ref[0],
                            preferred_element_type=jnp.float32) + bf1_ref[0], 0.0)
    ff = jnp.dot(h.astype(jnp.bfloat16), w2_ref[0],
                 preferred_element_type=jnp.float32) + bf2_ref[0]
    z = _layernorm(ff + y, g2_ref[0], be2_ref[0])

    xnew = z + x0                                   # DistGen: x = block(x) + x
    o_ref[0] = xnew

    # Distillation taps (resident output, written at the matching depth step).
    for j, dp in enumerate(dist_points):
        @pl.when(d == dp)
        def _(j=j, xnew=xnew):
            dist_ref[j, 0] = xnew


def linear_kernel(x_ref, w_ref, b_ref, o_ref):
    # K (=E) is resident, so no accumulator scratch is needed; the (E, tn)
    # weight tile is reused across the whole inner M loop.
    o_ref[...] = (jnp.dot(x_ref[...].astype(jnp.bfloat16), w_ref[...],
                          preferred_element_type=jnp.float32) + b_ref[...])


# ----------------------------------------------------------------------------
# Wrappers
# ----------------------------------------------------------------------------
_STACK_WEIGHT_NAMES = ("wqkv", "wu", "bu", "g1", "be1",
                       "w1", "bf1", "w2", "bf2", "g2", "be2")


def run_transformer_stack(x, kp, dist_points):
    b, t, e = x.shape
    heads = kp["heads"]
    depth = kp["wqkv"].shape[0]
    weights = [kp[n] for n in _STACK_WEIGHT_NAMES]

    kern = functools.partial(transformer_stack_kernel, heads=heads,
                             dist_points=tuple(int(p) for p in dist_points))

    in_specs = [pl.BlockSpec((1, t, e), lambda bi, d: (bi, 0, 0))]   # x (resident)
    for w in weights:
        # Per-layer weight slab, streamed (double-buffered) along depth.
        # TODO(synk): per-operand pl.Buffered tuning (big FF weights vs tiny
        # biases) skipped; default double-buffering is used for all weights.
        in_specs.append(pl.BlockSpec((1,) + w.shape[1:],
                                     lambda bi, d: (d, 0, 0)))

    out_shape = (jax.ShapeDtypeStruct((b, t, e), jnp.float32),
                 jax.ShapeDtypeStruct((3, b, t, e), jnp.float32))
    out_specs = (pl.BlockSpec((1, t, e), lambda bi, d: (bi, 0, 0)),      # resident
                 pl.BlockSpec((3, 1, t, e), lambda bi, d: (0, bi, 0, 0)))  # resident

    return pl.pallas_call(
        kern,
        out_shape=out_shape,
        grid=(b, depth),
        in_specs=in_specs,
        out_specs=out_specs,
        compiler_params=pltpu.CompilerParams(
            dimension_semantics=("parallel", "arbitrary"),
            vmem_limit_bytes=_VMEM_LIMIT),
    )(x, *weights)


def _largest_tile(dim, cap):
    t = min(dim, cap)
    while dim % t:
        t -= 1
    return t


def run_linear(x2d, w_bf16, b, *, tm_cap=256, tn_cap=512):
    """Tiled, weight-stationary (over the inner M loop) vocab projection."""
    m, k = x2d.shape
    n = w_bf16.shape[1]
    tm = _largest_tile(m, tm_cap)
    tn = _largest_tile(n, tn_cap)
    return pl.pallas_call(
        linear_kernel,
        out_shape=jax.ShapeDtypeStruct((m, n), jnp.float32),
        grid=(n // tn, m // tm),                       # weight tile outer
        in_specs=[pl.BlockSpec((tm, k), lambda j, i: (i, 0)),
                  pl.BlockSpec((k, tn), lambda j, i: (0, j)),
                  pl.BlockSpec((1, tn), lambda j, i: (0, j))],
        out_specs=pl.BlockSpec((tm, tn), lambda j, i: (i, j)),
        compiler_params=pltpu.CompilerParams(
            dimension_semantics=("parallel", "parallel"),
            vmem_limit_bytes=_VMEM_LIMIT),
    )(x2d, w_bf16, b)


def dist_gen_forward(x_ids, params, kparams):
    # Embedding lookups (gathers) kept as plain-JAX glue ops.
    tok = jnp.take(params["tok_emb"], x_ids, axis=0)             # (B, T, E)
    b, t, e = tok.shape
    pos = params["pos_emb"][:t][None, :, :]                       # (1, T, E)
    x = (tok + pos).astype(jnp.float32)

    depth = len(params["blocks"])
    quarter = depth // 4
    dist_points = (quarter - 1, 2 * quarter - 1, 3 * quarter - 1)

    x_out, dist = run_transformer_stack(x, kparams, dist_points)

    vocab = kparams["wp"].shape[1]
    out = run_linear(x_out.reshape(b * t, e), kparams["wp"],
                     kparams["bp"]).reshape(b, t, vocab)
    if quarter == 0:
        return out, None, None, None

    # One projection call for all three distillation taps → toprobsdist weight
    # is streamed from HBM once instead of three times.
    yd = run_linear(dist.reshape(3 * b * t, e), kparams["wpd"],
                    kparams["bpd"]).reshape(3, b, t, vocab)
    return out, yd[0], yd[1], yd[2]


# ----------------------------------------------------------------------------
# Parameters: canonical (f32, module-shaped) + kernel-ready (stacked, bf16)
# ----------------------------------------------------------------------------
def init_params(key, emb, heads, depth, seq_length, num_tokens, ff_mult=4):
    keys = jax.random.split(key, 6 + depth)

    def nrm(k, shape, scale=0.02):
        return (scale * jax.random.normal(k, shape)).astype(jnp.float32)

    params = {
        "heads": heads,
        "tok_emb": nrm(keys[0], (num_tokens, emb), 1.0),
        "pos_emb": nrm(keys[1], (seq_length, emb), 1.0),
        "wp": nrm(keys[2], (emb, num_tokens)),    # toprobs weight (pre-transposed)
        "bp": nrm(keys[3], (1, num_tokens)),
        "wpd": nrm(keys[4], (emb, num_tokens)),   # toprobsdist weight
        "bpd": nrm(keys[5], (1, num_tokens)),
        "blocks": [],
    }
    for d in range(depth):
        bk = jax.random.split(keys[6 + d], 8)
        params["blocks"].append({
            "wq": nrm(bk[0], (emb, emb)),
            "wk": nrm(bk[1], (emb, emb)),
            "wv": nrm(bk[2], (emb, emb)),
            "wu": nrm(bk[3], (emb, emb)),
            "bu": nrm(bk[4], (1, emb)),
            "g1": jnp.ones((1, emb), jnp.float32),
            "be1": jnp.zeros((1, emb), jnp.float32),
            "w1": nrm(bk[5], (emb, ff_mult * emb)),
            "bf1": nrm(bk[6], (1, ff_mult * emb)),
            "w2": nrm(bk[7], (ff_mult * emb, emb)),
            "bf2": jnp.zeros((1, emb), jnp.float32),
            "g2": jnp.ones((1, emb), jnp.float32),
            "be2": jnp.zeros((1, emb), jnp.float32),
        })
    return params


def prepare_params(params):
    """One-time packing: fuse QKV (scale folded into q/k), stack over depth,
    cast matmul weights to bf16 (biases/gains stay f32)."""
    e = params["tok_emb"].shape[1]
    scale = 1.0 / (e ** 0.25)
    cols = {n: [] for n in _STACK_WEIGHT_NAMES}
    for bp in params["blocks"]:
        cols["wqkv"].append(jnp.concatenate(
            [bp["wq"] * scale, bp["wk"] * scale, bp["wv"]], axis=1))
        for n in ("wu", "bu", "g1", "be1", "w1", "bf1", "w2", "bf2", "g2", "be2"):
            cols[n].append(bp[n])

    def st(name, dt):
        return jnp.stack(cols[name]).astype(dt)

    kp = {
        "heads": params["heads"],
        "wqkv": st("wqkv", jnp.bfloat16),
        "wu": st("wu", jnp.bfloat16),
        "w1": st("w1", jnp.bfloat16),
        "w2": st("w2", jnp.bfloat16),
        "bu": st("bu", jnp.float32),
        "g1": st("g1", jnp.float32), "be1": st("be1", jnp.float32),
        "bf1": st("bf1", jnp.float32), "bf2": st("bf2", jnp.float32),
        "g2": st("g2", jnp.float32), "be2": st("be2", jnp.float32),
        "wp": params["wp"].astype(jnp.bfloat16), "bp": params["bp"],
        "wpd": params["wpd"].astype(jnp.bfloat16), "bpd": params["bpd"],
    }
    return kp


# ----------------------------------------------------------------------------
# Pure-JAX reference (f32) for correctness check
# ----------------------------------------------------------------------------
def _ref_ln(y, g, b):
    mu = jnp.mean(y, axis=-1, keepdims=True)
    var = jnp.mean((y - mu) ** 2, axis=-1, keepdims=True)
    return (y - mu) / jnp.sqrt(var + EPS) * g + b


def _ref_block(x, p, heads):
    b, t, e = x.shape
    s = e // heads
    scale = 1.0 / (e ** 0.25)
    q = (x @ p["wq"]).reshape(b, t, heads, s).transpose(0, 2, 1, 3) * scale
    k = (x @ p["wk"]).reshape(b, t, heads, s).transpose(0, 2, 1, 3) * scale
    v = (x @ p["wv"]).reshape(b, t, heads, s).transpose(0, 2, 1, 3)
    dot = jnp.einsum("bhqs,bhks->bhqk", q, k)
    mask = jnp.triu(jnp.ones((t, t), bool), 1)
    dot = jnp.where(mask, -jnp.inf, dot)
    dot = jax.nn.softmax(dot, axis=-1)
    out = jnp.einsum("bhqk,bhks->bhqs", dot, v).transpose(0, 2, 1, 3).reshape(b, t, e)
    attended = out @ p["wu"] + p["bu"]
    y = _ref_ln(attended + x, p["g1"], p["be1"])
    ff = jax.nn.relu(y @ p["w1"] + p["bf1"]) @ p["w2"] + p["bf2"]
    z = _ref_ln(ff + y, p["g2"], p["be2"])
    return z + x


def _ref_forward(x_ids, params):
    tok = jnp.take(params["tok_emb"], x_ids, axis=0)
    b, t, e = tok.shape
    x = tok + params["pos_emb"][:t][None, :, :]
    depth = len(params["blocks"])
    qd = depth // 4
    dist_points = [qd - 1, 2 * qd - 1, 3 * qd - 1]
    dists = [None, None, None]
    for i, bp in enumerate(params["blocks"]):
        x = _ref_block(x, bp, params["heads"])
        for j in range(3):
            if i == dist_points[j]:
                dists[j] = x
                break
    out = x @ params["wp"] + params["bp"]
    ys = [None if d is None else d @ params["wpd"] + params["bpd"] for d in dists]
    return out, ys[0], ys[1], ys[2]


# ----------------------------------------------------------------------------
if __name__ == "__main__":
    # Lane-dense demo dims: E = 128, 4E = 512, vocab = 128 (multiples of 128).
    emb, heads, depth, seq_length, num_tokens = 128, 4, 4, 16, 128
    batch = 2

    key = jax.random.PRNGKey(0)
    kpar, kx = jax.random.split(key)
    params = init_params(kpar, emb, heads, depth, seq_length, num_tokens)
    kparams = prepare_params(params)
    x_ids = jax.random.randint(kx, (batch, seq_length), 0, num_tokens,
                               dtype=jnp.int32)

    outs = dist_gen_forward(x_ids, params, kparams)
    outs = jax.block_until_ready(outs)

    refs = _ref_forward(x_ids, params)

    for o, r in zip(outs, refs):
        assert o.shape == (batch, seq_length, num_tokens), o.shape
        assert bool(jnp.all(jnp.isfinite(o)))
        assert np.allclose(np.asarray(o), np.asarray(r), rtol=5e-2, atol=5e-2), \
            float(jnp.max(jnp.abs(o - np.asarray(r))))

    print("KERNEL_OK")
</pallas_src>

<mosaic_0001>
module attributes {stable_mosaic.version = 11 : i64} {
  func.func @transformer_stack_kernel(%arg0: i32, %arg1: i32, %arg2: memref<1x16x128xf32, #tpu.memory_space<vmem>>, %arg3: memref<1x128x384xbf16, #tpu.memory_space<vmem>>, %arg4: memref<1x128x128xbf16, #tpu.memory_space<vmem>>, %arg5: memref<1x1x128xf32, #tpu.memory_space<vmem>>, %arg6: memref<1x1x128xf32, #tpu.memory_space<vmem>>, %arg7: memref<1x1x128xf32, #tpu.memory_space<vmem>>, %arg8: memref<1x128x512xbf16, #tpu.memory_space<vmem>>, %arg9: memref<1x1x512xf32, #tpu.memory_space<vmem>>, %arg10: memref<1x512x128xbf16, #tpu.memory_space<vmem>>, %arg11: memref<1x1x128xf32, #tpu.memory_space<vmem>>, %arg12: memref<1x1x128xf32, #tpu.memory_space<vmem>>, %arg13: memref<1x1x128xf32, #tpu.memory_space<vmem>>, %arg14: memref<1x16x128xf32, #tpu.memory_space<vmem>>, %arg15: memref<3x1x16x128xf32, #tpu.memory_space<vmem>>) attributes {dimension_semantics = [#tpu.dimension_semantics<parallel>, #tpu.dimension_semantics<arbitrary>], iteration_bounds = array<i64: 2, 4>, scalar_prefetch = 0 : i64, scratch_operands = 0 : i64, tpu.core_type = #tpu.core_type<tc>, window_params = [{transform_indices = @transform_0, window_bounds = array<i64: 1, 16, 128>}, {transform_indices = @transform_1, window_bounds = array<i64: 1, 128, 384>}, {transform_indices = @transform_2, window_bounds = array<i64: 1, 128, 128>}, {transform_indices = @transform_3, window_bounds = array<i64: 1, 1, 128>}, {transform_indices = @transform_4, window_bounds = array<i64: 1, 1, 128>}, {transform_indices = @transform_5, window_bounds = array<i64: 1, 1, 128>}, {transform_indices = @transform_6, window_bounds = array<i64: 1, 128, 512>}, {transform_indices = @transform_7, window_bounds = array<i64: 1, 1, 512>}, {transform_indices = @transform_8, window_bounds = array<i64: 1, 512, 128>}, {transform_indices = @transform_9, window_bounds = array<i64: 1, 1, 128>}, {transform_indices = @transform_10, window_bounds = array<i64: 1, 1, 128>}, {transform_indices = @transform_11, window_bounds = array<i64: 1, 1, 128>}, {transform_indices = @transform_12, window_bounds = array<i64: 1, 16, 128>}, {transform_indices = @transform_13, window_bounds = array<i64: 3, 1, 16, 128>}]} {
    %c0_i32 = arith.constant 0 : i32
    %0 = arith.cmpi eq, %arg1, %c0_i32 : i32
    %1 = arith.extui %0 : i1 to i32
    %c0_i32_0 = arith.constant 0 : i32
    %2 = arith.cmpi ne, %1, %c0_i32_0 : i32
    scf.if %2 {
      %c0_62 = arith.constant 0 : index
      %c0_63 = arith.constant 0 : index
      %c0_64 = arith.constant 0 : index
      %165 = vector.load %arg2[%c0_62, %c0_63, %c0_64] : memref<1x16x128xf32, #tpu.memory_space<vmem>>, vector<1x16x128xf32>
      %c0_65 = arith.constant 0 : index
      %c0_66 = arith.constant 0 : index
      %c0_67 = arith.constant 0 : index
      %166 = vector.load %arg14[%c0_65, %c0_66, %c0_67] : memref<1x16x128xf32, #tpu.memory_space<vmem>>, vector<1x16x128xf32>
      tpu.vector_store %arg14[%c0_65, %c0_66, %c0_67], %165 {strides = array<i32>} : memref<1x16x128xf32, #tpu.memory_space<vmem>>, vector<1x16x128xf32>,
    } else {
    }
    %c0 = arith.constant 0 : index
    %c0_1 = arith.constant 0 : index
    %c0_2 = arith.constant 0 : index
    %3 = vector.load %arg14[%c0, %c0_1, %c0_2] : memref<1x16x128xf32, #tpu.memory_space<vmem>>, vector<1x16x128xf32>
    %4 = vector.shape_cast %3 : vector<1x16x128xf32> to vector<16x128xf32>
    %5 = arith.truncf %4 : vector<16x128xf32> to vector<16x128xbf16>
    %c0_3 = arith.constant 0 : index
    %c0_4 = arith.constant 0 : index
    %c0_5 = arith.constant 0 : index
    %6 = vector.load %arg3[%c0_3, %c0_4, %c0_5] : memref<1x128x384xbf16, #tpu.memory_space<vmem>>, vector<1x128x384xbf16>
    %7 = vector.shape_cast %6 : vector<1x128x384xbf16> to vector<128x384xbf16>
    %cst = arith.constant dense<0.000000e+00> : vector<16x384xf32>
    %8 = tpu.matmul %5, %7, %cst {dimension_numbers = #tpu.dot_dimension_numbers<[1], [0], [0], [1], [0, 0, 1, 1], [], []>} : vector<16x128xbf16>, vector<128x384xbf16>, vector<16x384xf32> -> vector<16x384xf32>
    %9 = vector.extract_strided_slice %8 {offsets = [0, 0], sizes = [16, 128], strides = [1, 1]} : vector<16x384xf32> to vector<16x128xf32>
    %10 = vector.extract_strided_slice %8 {offsets = [0, 128], sizes = [16, 128], strides = [1, 1]} : vector<16x384xf32> to vector<16x128xf32>
    %11 = vector.extract_strided_slice %8 {offsets = [0, 256], sizes = [16, 128], strides = [1, 1]} : vector<16x384xf32> to vector<16x128xf32>
    %12 = vector.extract_strided_slice %9 {offsets = [0, 0], sizes = [16, 32], strides = [1, 1]} : vector<16x128xf32> to vector<16x32xf32>
    %13 = vector.extract_strided_slice %9 {offsets = [0, 32], sizes = [16, 32], strides = [1, 1]} : vector<16x128xf32> to vector<16x32xf32>
    %14 = vector.extract_strided_slice %9 {offsets = [0, 64], sizes = [16, 32], strides = [1, 1]} : vector<16x128xf32> to vector<16x32xf32>
    %15 = vector.extract_strided_slice %9 {offsets = [0, 96], sizes = [16, 32], strides = [1, 1]} : vector<16x128xf32> to vector<16x32xf32>
    %16 = vector.shape_cast %12 : vector<16x32xf32> to vector<1x16x32xf32>
    %17 = vector.shape_cast %13 : vector<16x32xf32> to vector<1x16x32xf32>
    %18 = vector.shape_cast %14 : vector<16x32xf32> to vector<1x16x32xf32>
    %19 = vector.shape_cast %15 : vector<16x32xf32> to vector<1x16x32xf32>
    %20 = tpu.concatenate %16, %17, %18, %19 in 0 : vector<1x16x32xf32>, vector<1x16x32xf32>, vector<1x16x32xf32>, vector<1x16x32xf32> -> vector<4x16x32xf32>
    %21 = arith.truncf %20 : vector<4x16x32xf32> to vector<4x16x32xbf16>
    %22 = vector.extract_strided_slice %10 {offsets = [0, 0], sizes = [16, 32], strides = [1, 1]} : vector<16x128xf32> to vector<16x32xf32>
    %23 = vector.extract_strided_slice %10 {offsets = [0, 32], sizes = [16, 32], strides = [1, 1]} : vector<16x128xf32> to vector<16x32xf32>
    %24 = vector.extract_strided_slice %10 {offsets = [0, 64], sizes = [16, 32], strides = [1, 1]} : vector<16x128xf32> to vector<16x32xf32>
    %25 = vector.extract_strided_slice %10 {offsets = [0, 96], sizes = [16, 32], strides = [1, 1]} : vector<16x128xf32> to vector<16x32xf32>
    %26 = vector.shape_cast %22 : vector<16x32xf32> to vector<1x16x32xf32>
    %27 = vector.shape_cast %23 : vector<16x32xf32> to vector<1x16x32xf32>
    %28 = vector.shape_cast %24 : vector<16x32xf32> to vector<1x16x32xf32>
    %29 = vector.shape_cast %25 : vector<16x32xf32> to vector<1x16x32xf32>
    %30 = tpu.concatenate %26, %27, %28, %29 in 0 : vector<1x16x32xf32>, vector<1x16x32xf32>, vector<1x16x32xf32>, vector<1x16x32xf32> -> vector<4x16x32xf32>
    %31 = arith.truncf %30 : vector<4x16x32xf32> to vector<4x16x32xbf16>
    %32 = vector.extract_strided_slice %11 {offsets = [0, 0], sizes = [16, 32], strides = [1, 1]} : vector<16x128xf32> to vector<16x32xf32>
    %33 = vector.extract_strided_slice %11 {offsets = [0, 32], sizes = [16, 32], strides = [1, 1]} : vector<16x128xf32> to vector<16x32xf32>
    %34 = vector.extract_strided_slice %11 {offsets = [0, 64], sizes = [16, 32], strides = [1, 1]} : vector<16x128xf32> to vector<16x32xf32>
    %35 = vector.extract_strided_slice %11 {offsets = [0, 96], sizes = [16, 32], strides = [1, 1]} : vector<16x128xf32> to vector<16x32xf32>
    %36 = vector.shape_cast %32 : vector<16x32xf32> to vector<1x16x32xf32>
    %37 = vector.shape_cast %33 : vector<16x32xf32> to vector<1x16x32xf32>
    %38 = vector.shape_cast %34 : vector<16x32xf32> to vector<1x16x32xf32>
    %39 = vector.shape_cast %35 : vector<16x32xf32> to vector<1x16x32xf32>
    %40 = tpu.concatenate %36, %37, %38, %39 in 0 : vector<1x16x32xf32>, vector<1x16x32xf32>, vector<1x16x32xf32>, vector<1x16x32xf32> -> vector<4x16x32xf32>
    %41 = arith.truncf %40 : vector<4x16x32xf32> to vector<4x16x32xbf16>
    "tpu.trace_start"() <{level = 10 : i32, message = "hqd,hkd->hqk"}> : () -> ()
    %cst_6 = arith.constant dense<0.000000e+00> : vector<4x16x16xf32>
    %42 = tpu.matmul %21, %31, %cst_6 {dimension_numbers = #tpu.dot_dimension_numbers<[2], [2], [1], [1], [0, 0, 0, 1, 1, 1], [0], [0]>} : vector<4x16x32xbf16>, vector<4x16x32xbf16>, vector<4x16x16xf32> -> vector<4x16x16xf32>
    "tpu.trace_stop"() : () -> ()
    %43 = tpu.iota {dimensions = array<i32: 0>} : vector<16x16xi32>
    %44 = tpu.iota {dimensions = array<i32: 1>} : vector<16x16xi32>
    %45 = arith.cmpi sgt, %44, %43 : vector<16x16xi32>
    %46 = vector.shape_cast %45 : vector<16x16xi1> to vector<1x16x16xi1>
    %cst_7 = arith.constant -1.000000e+30 : f32
    %47 = vector.shape_cast %46 : vector<1x16x16xi1> to vector<1x16x16xi1>
    %48 = vector.broadcast %47 : vector<1x16x16xi1> to vector<4x16x16xi1>
    %49 = vector.broadcast %cst_7 : f32 to vector<4x16x16xf32>
    %50 = arith.select %48, %49, %42 : vector<4x16x16xi1>, vector<4x16x16xf32>
    %cst_8 = arith.constant dense<0xFF800000> : vector<4x16xf32>
    %51 = vector.multi_reduction <maximumf>, %50, %cst_8 [2] : vector<4x16x16xf32> to vector<4x16xf32>
    %52 = vector.shape_cast %51 : vector<4x16xf32> to vector<4x16x1xf32>
    %53 = vector.broadcast %52 : vector<4x16x1xf32> to vector<4x16x16xf32>
    %54 = arith.subf %50, %53 : vector<4x16x16xf32>
    %55 = math.exp %54 : vector<4x16x16xf32>
    %cst_9 = arith.constant dense<0.000000e+00> : vector<4x16xf32>
    %56 = vector.multi_reduction <add>, %55, %cst_9 [2] : vector<4x16x16xf32> to vector<4x16xf32>
    %57 = vector.shape_cast %56 : vector<4x16xf32> to vector<4x16x1xf32>
    %58 = tpu.reciprocal %57 {approx = true} : vector<4x16x1xf32> -> vector<4x16x1xf32>
    %59 = vector.broadcast %58 : vector<4x16x1xf32> to vector<4x16x16xf32>
    %60 = arith.mulf %55, %59 : vector<4x16x16xf32>
    %61 = arith.truncf %60 : vector<4x16x16xf32> to vector<4x16x16xbf16>
    "tpu.trace_start"() <{level = 10 : i32, message = "hqk,hkd->hqd"}> : () -> ()
    %cst_10 = arith.constant dense<0.000000e+00> : vector<4x16x32xf32>
    %62 = tpu.matmul %61, %41, %cst_10 {dimension_numbers = #tpu.dot_dimension_numbers<[2], [1], [1], [2], [0, 0, 0, 1, 1, 2], [0], [0]>} : vector<4x16x16xbf16>, vector<4x16x32xbf16>, vector<4x16x32xf32> -> vector<4x16x32xf32>
    "tpu.trace_stop"() : () -> ()
    %63 = vector.extract_strided_slice %62 {offsets = [0, 0, 0], sizes = [1, 16, 32], strides = [1, 1, 1]} : vector<4x16x32xf32> to vector<1x16x32xf32>
    %64 = vector.shape_cast %63 : vector<1x16x32xf32> to vector<16x32xf32>
    %65 = vector.extract_strided_slice %62 {offsets = [1, 0, 0], sizes = [1, 16, 32], strides = [1, 1, 1]} : vector<4x16x32xf32> to vector<1x16x32xf32>
    %66 = vector.shape_cast %65 : vector<1x16x32xf32> to vector<16x32xf32>
    %67 = vector.extract_strided_slice %62 {offsets = [2, 0, 0], sizes = [1, 16, 32], strides = [1, 1, 1]} : vector<4x16x32xf32> to vector<1x16x32xf32>
    %68 = vector.shape_cast %67 : vector<1x16x32xf32> to vector<16x32xf32>
    %69 = vector.extract_strided_slice %62 {offsets = [3, 0, 0], sizes = [1, 16, 32], strides = [1, 1, 1]} : vector<4x16x32xf32> to vector<1x16x32xf32>
    %70 = vector.shape_cast %69 : vector<1x16x32xf32> to vector<16x32xf32>
    %71 = tpu.concatenate %64, %66, %68, %70 in 1 : vector<16x32xf32>, vector<16x32xf32>, vector<16x32xf32>, vector<16x32xf32> -> vector<16x128xf32>
    %72 = arith.truncf %71 : vector<16x128xf32> to vector<16x128xbf16>
    %c0_11 = arith.constant 0 : index
    %c0_12 = arith.constant 0 : index
    %c0_13 = arith.constant 0 : index
    %73 = vector.load %arg4[%c0_11, %c0_12, %c0_13] : memref<1x128x128xbf16, #tpu.memory_space<vmem>>, vector<1x128x128xbf16>
    %74 = vector.shape_cast %73 : vector<1x128x128xbf16> to vector<128x128xbf16>
    %cst_14 = arith.constant dense<0.000000e+00> : vector<16x128xf32>
    %75 = tpu.matmul %72, %74, %cst_14 {dimension_numbers = #tpu.dot_dimension_numbers<[1], [0], [0], [1], [0, 0, 1, 1], [], []>} : vector<16x128xbf16>, vector<128x128xbf16>, vector<16x128xf32> -> vector<16x128xf32>
    %c0_15 = arith.constant 0 : index
    %c0_16 = arith.constant 0 : index
    %c0_17 = arith.constant 0 : index
    %76 = vector.load %arg5[%c0_15, %c0_16, %c0_17] : memref<1x1x128xf32, #tpu.memory_space<vmem>>, vector<1x1x128xf32>
    %77 = vector.shape_cast %76 : vector<1x1x128xf32> to vector<1x128xf32>
    %78 = vector.broadcast %77 : vector<1x128xf32> to vector<16x128xf32>
    %79 = arith.addf %75, %78 : vector<16x128xf32>
    %80 = arith.addf %79, %4 : vector<16x128xf32>
    %c0_18 = arith.constant 0 : index
    %c0_19 = arith.constant 0 : index
    %c0_20 = arith.constant 0 : index
    %81 = vector.load %arg6[%c0_18, %c0_19, %c0_20] : memref<1x1x128xf32, #tpu.memory_space<vmem>>, vector<1x1x128xf32>
    %82 = vector.shape_cast %81 : vector<1x1x128xf32> to vector<1x128xf32>
    %c0_21 = arith.constant 0 : index
    %c0_22 = arith.constant 0 : index
    %c0_23 = arith.constant 0 : index
    %83 = vector.load %arg7[%c0_21, %c0_22, %c0_23] : memref<1x1x128xf32, #tpu.memory_space<vmem>>, vector<1x1x128xf32>
    %84 = vector.shape_cast %83 : vector<1x1x128xf32> to vector<1x128xf32>
    %cst_24 = arith.constant dense<0.000000e+00> : vector<16xf32>
    %85 = vector.multi_reduction <add>, %80, %cst_24 [1] : vector<16x128xf32> to vector<16xf32>
    %86 = vector.shape_cast %85 : vector<16xf32> to vector<16x1xf32>
    %cst_25 = arith.constant 1.280000e+02 : f32
    %87 = vector.broadcast %cst_25 : f32 to vector<16x1xf32>
    %88 = arith.divf %86, %87 : vector<16x1xf32>
    %89 = vector.broadcast %88 : vector<16x1xf32> to vector<16x128xf32>
    %90 = arith.subf %80, %89 : vector<16x128xf32>
    %91 = arith.mulf %90, %90 : vector<16x128xf32>
    %cst_26 = arith.constant dense<0.000000e+00> : vector<16xf32>
    %92 = vector.multi_reduction <add>, %91, %cst_26 [1] : vector<16x128xf32> to vector<16xf32>
    %93 = vector.shape_cast %92 : vector<16xf32> to vector<16x1xf32>
    %cst_27 = arith.constant 1.280000e+02 : f32
    %94 = vector.broadcast %cst_27 : f32 to vector<16x1xf32>
    %95 = arith.divf %93, %94 : vector<16x1xf32>
    %96 = vector.broadcast %88 : vector<16x1xf32> to vector<16x128xf32>
    %97 = arith.subf %80, %96 : vector<16x128xf32>
    %cst_28 = arith.constant 9.99999974E-6 : f32
    %98 = vector.broadcast %cst_28 : f32 to vector<16x1xf32>
    %99 = arith.addf %95, %98 : vector<16x1xf32>
    %100 = math.rsqrt %99 : vector<16x1xf32>
    %101 = vector.broadcast %100 : vector<16x1xf32> to vector<16x128xf32>
    %102 = arith.mulf %97, %101 : vector<16x128xf32>
    %103 = vector.broadcast %82 : vector<1x128xf32> to vector<16x128xf32>
    %104 = arith.mulf %102, %103 : vector<16x128xf32>
    %105 = vector.broadcast %84 : vector<1x128xf32> to vector<16x128xf32>
    %106 = arith.addf %104, %105 : vector<16x128xf32>
    %107 = arith.truncf %106 : vector<16x128xf32> to vector<16x128xbf16>
    %c0_29 = arith.constant 0 : index
    %c0_30 = arith.constant 0 : index
    %c0_31 = arith.constant 0 : index
    %108 = vector.load %arg8[%c0_29, %c0_30, %c0_31] : memref<1x128x512xbf16, #tpu.memory_space<vmem>>, vector<1x128x512xbf16>
    %109 = vector.shape_cast %108 : vector<1x128x512xbf16> to vector<128x512xbf16>
    %cst_32 = arith.constant dense<0.000000e+00> : vector<16x512xf32>
    %110 = tpu.matmul %107, %109, %cst_32 {dimension_numbers = #tpu.dot_dimension_numbers<[1], [0], [0], [1], [0, 0, 1, 1], [], []>} : vector<16x128xbf16>, vector<128x512xbf16>, vector<16x512xf32> -> vector<16x512xf32>
    %c0_33 = arith.constant 0 : index
    %c0_34 = arith.constant 0 : index
    %c0_35 = arith.constant 0 : index
    %111 = vector.load %arg9[%c0_33, %c0_34, %c0_35] : memref<1x1x512xf32, #tpu.memory_space<vmem>>, vector<1x1x512xf32>
    %112 = vector.shape_cast %111 : vector<1x1x512xf32> to vector<1x512xf32>
    %113 = vector.broadcast %112 : vector<1x512xf32> to vector<16x512xf32>
    %114 = arith.addf %110, %113 : vector<16x512xf32>
    %cst_36 = arith.constant 0.000000e+00 : f32
    %115 = vector.broadcast %cst_36 : f32 to vector<16x512xf32>
    %116 = arith.maximumf %114, %115 : vector<16x512xf32>
    %117 = arith.truncf %116 : vector<16x512xf32> to vector<16x512xbf16>
    %c0_37 = arith.constant 0 : index
    %c0_38 = arith.constant 0 : index
    %c0_39 = arith.constant 0 : index
    %118 = vector.load %arg10[%c0_37, %c0_38, %c0_39] : memref<1x512x128xbf16, #tpu.memory_space<vmem>>, vector<1x512x128xbf16>
    %119 = vector.shape_cast %118 : vector<1x512x128xbf16> to vector<512x128xbf16>
    %cst_40 = arith.constant dense<0.000000e+00> : vector<16x128xf32>
    %120 = tpu.matmul %117, %119, %cst_40 {dimension_numbers = #tpu.dot_dimension_numbers<[1], [0], [0], [1], [0, 0, 1, 1], [], []>} : vector<16x512xbf16>, vector<512x128xbf16>, vector<16x128xf32> -> vector<16x128xf32>
    %c0_41 = arith.constant 0 : index
    %c0_42 = arith.constant 0 : index
    %c0_43 = arith.constant 0 : index
    %121 = vector.load %arg11[%c0_41, %c0_42, %c0_43] : memref<1x1x128xf32, #tpu.memory_space<vmem>>, vector<1x1x128xf32>
    %122 = vector.shape_cast %121 : vector<1x1x128xf32> to vector<1x128xf32>
    %123 = vector.broadcast %122 : vector<1x128xf32> to vector<16x128xf32>
    %124 = arith.addf %120, %123 : vector<16x128xf32>
    %125 = arith.addf %124, %106 : vector<16x128xf32>
    %c0_44 = arith.constant 0 : index
    %c0_45 = arith.constant 0 : index
    %c0_46 = arith.constant 0 : index
    %126 = vector.load %arg12[%c0_44, %c0_45, %c0_46] : memref<1x1x128xf32, #tpu.memory_space<vmem>>, vector<1x1x128xf32>
    %127 = vector.shape_cast %126 : vector<1x1x128xf32> to vector<1x128xf32>
    %c0_47 = arith.constant 0 : index
    %c0_48 = arith.constant 0 : index
    %c0_49 = arith.constant 0 : index
    %128 = vector.load %arg13[%c0_47, %c0_48, %c0_49] : memref<1x1x128xf32, #tpu.memory_space<vmem>>, vector<1x1x128xf32>
    %129 = vector.shape_cast %128 : vector<1x1x128xf32> to vector<1x128xf32>
    %cst_50 = arith.constant dense<0.000000e+00> : vector<16xf32>
    %130 = vector.multi_reduction <add>, %125, %cst_50 [1] : vector<16x128xf32> to vector<16xf32>
    %131 = vector.shape_cast %130 : vector<16xf32> to vector<16x1xf32>
    %cst_51 = arith.constant 1.280000e+02 : f32
    %132 = vector.broadcast %cst_51 : f32 to vector<16x1xf32>
    %133 = arith.divf %131, %132 : vector<16x1xf32>
    %134 = vector.broadcast %133 : vector<16x1xf32> to vector<16x128xf32>
    %135 = arith.subf %125, %134 : vector<16x128xf32>
    %136 = arith.mulf %135, %135 : vector<16x128xf32>
    %cst_52 = arith.constant dense<0.000000e+00> : vector<16xf32>
    %137 = vector.multi_reduction <add>, %136, %cst_52 [1] : vector<16x128xf32> to vector<16xf32>
    %138 = vector.shape_cast %137 : vector<16xf32> to vector<16x1xf32>
    %cst_53 = arith.constant 1.280000e+02 : f32
    %139 = vector.broadcast %cst_53 : f32 to vector<16x1xf32>
    %140 = arith.divf %138, %139 : vector<16x1xf32>
    %141 = vector.broadcast %133 : vector<16x1xf32> to vector<16x128xf32>
    %142 = arith.subf %125, %141 : vector<16x128xf32>
    %cst_54 = arith.constant 9.99999974E-6 : f32
    %143 = vector.broadcast %cst_54 : f32 to vector<16x1xf32>
    %144 = arith.addf %140, %143 : vector<16x1xf32>
    %145 = math.rsqrt %144 : vector<16x1xf32>
    %146 = vector.broadcast %145 : vector<16x1xf32> to vector<16x128xf32>
    %147 = arith.mulf %142, %146 : vector<16x128xf32>
    %148 = vector.broadcast %127 : vector<1x128xf32> to vector<16x128xf32>
    %149 = arith.mulf %147, %148 : vector<16x128xf32>
    %150 = vector.broadcast %129 : vector<1x128xf32> to vector<16x128xf32>
    %151 = arith.addf %149, %150 : vector<16x128xf32>
    %152 = arith.addf %151, %4 : vector<16x128xf32>
    %c0_55 = arith.constant 0 : index
    %c0_56 = arith.constant 0 : index
    %c0_57 = arith.constant 0 : index
    %153 = vector.load %arg14[%c0_55, %c0_56, %c0_57] : memref<1x16x128xf32, #tpu.memory_space<vmem>>, vector<1x16x128xf32>
    %154 = vector.shape_cast %153 : vector<1x16x128xf32> to vector<16x128xf32>
    %155 = vector.shape_cast %152 : vector<16x128xf32> to vector<1x16x128xf32>
    tpu.vector_store %arg14[%c0_55, %c0_56, %c0_57], %155 {strides = array<i32>} : memref<1x16x128xf32, #tpu.memory_space<vmem>>, vector<1x16x128xf32>,
    %c0_i32_58 = arith.constant 0 : i32
    %156 = arith.cmpi eq, %arg1, %c0_i32_58 : i32
    %157 = arith.extui %156 : i1 to i32
    %c0_i32_59 = arith.constant 0 : i32
    %158 = arith.cmpi ne, %157, %c0_i32_59 : i32
    scf.if %158 {
      %c0_62 = arith.constant 0 : index
      %c0_63 = arith.constant 0 : index
      %c0_64 = arith.constant 0 : index
      %c0_65 = arith.constant 0 : index
      %165 = vector.load %arg15[%c0_62, %c0_63, %c0_64, %c0_65] : memref<3x1x16x128xf32, #tpu.memory_space<vmem>>, vector<1x1x16x128xf32>
      %166 = vector.shape_cast %165 : vector<1x1x16x128xf32> to vector<16x128xf32>
      %167 = vector.shape_cast %152 : vector<16x128xf32> to vector<1x1x16x128xf32>
      tpu.vector_store %arg15[%c0_62, %c0_63, %c0_64, %c0_65], %167 {strides = array<i32>} : memref<3x1x16x128xf32, #tpu.memory_space<vmem>>, vector<1x1x16x128xf32>,
    } else {
    }
    %c1_i32 = arith.constant 1 : i32
    %159 = arith.cmpi eq, %arg1, %c1_i32 : i32
    %160 = arith.extui %159 : i1 to i32
    %c0_i32_60 = arith.constant 0 : i32
    %161 = arith.cmpi ne, %160, %c0_i32_60 : i32
    scf.if %161 {
      %c1 = arith.constant 1 : index
      %c0_62 = arith.constant 0 : index
      %c0_63 = arith.constant 0 : index
      %c0_64 = arith.constant 0 : index
      %165 = vector.load %arg15[%c1, %c0_62, %c0_63, %c0_64] : memref<3x1x16x128xf32, #tpu.memory_space<vmem>>, vector<1x1x16x128xf32>
      %166 = vector.shape_cast %165 : vector<1x1x16x128xf32> to vector<16x128xf32>
      %167 = vector.shape_cast %152 : vector<16x128xf32> to vector<1x1x16x128xf32>
      tpu.vector_store %arg15[%c1, %c0_62, %c0_63, %c0_64], %167 {strides = array<i32>} : memref<3x1x16x128xf32, #tpu.memory_space<vmem>>, vector<1x1x16x128xf32>,
    } else {
    }
    %c2_i32 = arith.constant 2 : i32
    %162 = arith.cmpi eq, %arg1, %c2_i32 : i32
    %163 = arith.extui %162 : i1 to i32
    %c0_i32_61 = arith.constant 0 : i32
    %164 = arith.cmpi ne, %163, %c0_i32_61 : i32
    scf.if %164 {
      %c2 = arith.constant 2 : index
      %c0_62 = arith.constant 0 : index
      %c0_63 = arith.constant 0 : index
      %c0_64 = arith.constant 0 : index
      %165 = vector.load %arg15[%c2, %c0_62, %c0_63, %c0_64] : memref<3x1x16x128xf32, #tpu.memory_space<vmem>>, vector<1x1x16x128xf32>
      %166 = vector.shape_cast %165 : vector<1x1x16x128xf32> to vector<16x128xf32>
      %167 = vector.shape_cast %152 : vector<16x128xf32> to vector<1x1x16x128xf32>
      tpu.vector_store %arg15[%c2, %c0_62, %c0_63, %c0_64], %167 {strides = array<i32>} : memref<3x1x16x128xf32, #tpu.memory_space<vmem>>, vector<1x1x16x128xf32>,
    } else {
    }
    return
  }
  func.func @transform_0(%arg0: i32, %arg1: i32) -> (i32, i32, i32) {
    %c0_i32 = arith.constant 0 : i32
    %c0_i32_0 = arith.constant 0 : i32
    %c0_i32_1 = arith.constant 0 : i32
    return %arg0, %c0_i32, %c0_i32_0 : i32, i32, i32
  }
  func.func @transform_1(%arg0: i32, %arg1: i32) -> (i32, i32, i32) {
    %c0_i32 = arith.constant 0 : i32
    %c0_i32_0 = arith.constant 0 : i32
    %c0_i32_1 = arith.constant 0 : i32
    return %arg1, %c0_i32, %c0_i32_0 : i32, i32, i32
  }
  func.func @transform_2(%arg0: i32, %arg1: i32) -> (i32, i32, i32) {
    %c0_i32 = arith.constant 0 : i32
    %c0_i32_0 = arith.constant 0 : i32
    %c0_i32_1 = arith.constant 0 : i32
    return %arg1, %c0_i32, %c0_i32_0 : i32, i32, i32
  }
  func.func @transform_3(%arg0: i32, %arg1: i32) -> (i32, i32, i32) {
    %c0_i32 = arith.constant 0 : i32
    %c0_i32_0 = arith.constant 0 : i32
    %c0_i32_1 = arith.constant 0 : i32
    return %arg1, %c0_i32, %c0_i32_0 : i32, i32, i32
  }
  func.func @transform_4(%arg0: i32, %arg1: i32) -> (i32, i32, i32) {
    %c0_i32 = arith.constant 0 : i32
    %c0_i32_0 = arith.constant 0 : i32
    %c0_i32_1 = arith.constant 0 : i32
    return %arg1, %c0_i32, %c0_i32_0 : i32, i32, i32
  }
  func.func @transform_5(%arg0: i32, %arg1: i32) -> (i32, i32, i32) {
    %c0_i32 = arith.constant 0 : i32
    %c0_i32_0 = arith.constant 0 : i32
    %c0_i32_1 = arith.constant 0 : i32
    return %arg1, %c0_i32, %c0_i32_0 : i32, i32, i32
  }
  func.func @transform_6(%arg0: i32, %arg1: i32) -> (i32, i32, i32) {
    %c0_i32 = arith.constant 0 : i32
    %c0_i32_0 = arith.constant 0 : i32
    %c0_i32_1 = arith.constant 0 : i32
    return %arg1, %c0_i32, %c0_i32_0 : i32, i32, i32
  }
  func.func @transform_7(%arg0: i32, %arg1: i32) -> (i32, i32, i32) {
    %c0_i32 = arith.constant 0 : i32
    %c0_i32_0 = arith.constant 0 : i32
    %c0_i32_1 = arith.constant 0 : i32
    return %arg1, %c0_i32, %c0_i32_0 : i32, i32, i32
  }
  func.func @transform_8(%arg0: i32, %arg1: i32) -> (i32, i32, i32) {
    %c0_i32 = arith.constant 0 : i32
    %c0_i32_0 = arith.constant 0 : i32
    %c0_i32_1 = arith.constant 0 : i32
    return %arg1, %c0_i32, %c0_i32_0 : i32, i32, i32
  }
  func.func @transform_9(%arg0: i32, %arg1: i32) -> (i32, i32, i32) {
    %c0_i32 = arith.constant 0 : i32
    %c0_i32_0 = arith.constant 0 : i32
    %c0_i32_1 = arith.constant 0 : i32
    return %arg1, %c0_i32, %c0_i32_0 : i32, i32, i32
  }
  func.func @transform_10(%arg0: i32, %arg1: i32) -> (i32, i32, i32) {
    %c0_i32 = arith.constant 0 : i32
    %c0_i32_0 = arith.constant 0 : i32
    %c0_i32_1 = arith.constant 0 : i32
    return %arg1, %c0_i32, %c0_i32_0 : i32, i32, i32
  }
  func.func @transform_11(%arg0: i32, %arg1: i32) -> (i32, i32, i32) {
    %c0_i32 = arith.constant 0 : i32
    %c0_i32_0 = arith.constant 0 : i32
    %c0_i32_1 = arith.constant 0 : i32
    return %arg1, %c0_i32, %c0_i32_0 : i32, i32, i32
  }
  func.func @transform_12(%arg0: i32, %arg1: i32) -> (i32, i32, i32) {
    %c0_i32 = arith.constant 0 : i32
    %c0_i32_0 = arith.constant 0 : i32
    %c0_i32_1 = arith.constant 0 : i32
    return %arg0, %c0_i32, %c0_i32_0 : i32, i32, i32
  }
  func.func @transform_13(%arg0: i32, %arg1: i32) -> (i32, i32, i32, i32) {
    %c0_i32 = arith.constant 0 : i32
    %c0_i32_0 = arith.constant 0 : i32
    %c0_i32_1 = arith.constant 0 : i32
    %c0_i32_2 = arith.constant 0 : i32
    return %c0_i32, %arg0, %c0_i32_0, %c0_i32_1 : i32, i32, i32, i32
  }
}

</mosaic_0001>

<bundles_post_ra>
// kernel: tpu_custom_call.1
= control target key start
LH: loop header
LB: loop body
LE: loop exit
PB: predicated region body
PF: predicated region fallthrough
CT: control target
= control target key end

     0   :  { %s4701_s0 = inlined_call_operand.hbm [shape: f32[2,16,128], index: 0, kind: input, shape index: {}]   ;;  %s4702_s1 = inlined_call_operand.hbm [shape: bf16[4,128,384], index: 1, kind: input, shape index: {}]   ;;  %s4703_s2 = inlined_call_operand.hbm [shape: bf16[4,128,128], index: 2, kind: input, shape index: {}]   ;;  %s4704_s3 = inlined_call_operand.vmem [shape: f32[4,1,128], index: 3, kind: input, shape index: {}]   ;;  %s4705_s4 = inlined_call_operand.hbm [shape: f32[4,1,128], index: 4, kind: input, shape index: {}]   ;;  %s4706_s5 = inlined_call_operand.vmem [shape: f32[4,1,128], index: 5, kind: input, shape index: {}]   ;;  %s4707_s6 = inlined_call_operand.hbm [shape: bf16[4,128,512], index: 6, kind: input, shape index: {}]   ;;  %s4708_s7 = inlined_call_operand.hbm [shape: f32[4,1,512], index: 7, kind: input, shape index: {}]   ;;  %s4709_s8 = inlined_call_operand.hbm [shape: bf16[4,512,128], index: 8, kind: input, shape index: {}]   ;;  %s4710_s9 = inlined_call_operand.vmem [shape: f32[4,1,128], index: 9, kind: input, shape index: {}]   ;;  %s4711_s10 = inlined_call_operand.vmem [shape: f32[4,1,128], index: 10, kind: input, shape index: {}]   ;;  %s4712_s11 = inlined_call_operand.vmem [shape: f32[4,1,128], index: 11, kind: input, shape index: {}]   ;;  %s4713_s12 = inlined_call_operand.hbm [shape: f32[2,16,128], index: 12, kind: output, shape index: {0}]   ;;  %s4714_s13 = inlined_call_operand.hbm [shape: f32[3,2,16,128], index: 13, kind: output, shape index: {1}]  }
   0x1   :  { %4742 = sst [smem:[#allocation42_spill]] %s4701_s0 }
   0x2   :  { %4743 = sst [smem:[#allocation43_spill]] %s4702_s1 }
   0x3   :  { %4744 = sst [smem:[#allocation44_spill]] %s4703_s2 }
   0x4   :  { %4745 = sst [smem:[#allocation45_spill]] %s4704_s3 }
   0x5   :  { %4746 = sst [smem:[#allocation46_spill]] %s4705_s4 }
   0x6   :  { %4747 = sst [smem:[#allocation47_spill]] %s4706_s5 }
   0x7   :  { %4748 = sst [smem:[#allocation48_spill]] %s4707_s6 }
   0x8   :  { %4749 = sst [smem:[#allocation49_spill]] %s4708_s7 }
   0x9   :  { %4750 = sst [smem:[#allocation50_spill]] %s4709_s8 }
   0xa   :  { %4751 = sst [smem:[#allocation51_spill]] %s4710_s9 }
   0xb   :  { %4752 = sst [smem:[#allocation52_spill]] %s4711_s10 }
   0xc   :  { %4753 = sst [smem:[#allocation53_spill]] %s4712_s11 }
   0xd   :  { %4754 = sst [smem:[#allocation54_spill]] %s4713_s12 }
   0xe   :  { %4755 = sst [smem:[#allocation55_spill]] %s4714_s13 }
   0xf   :  { %19 = vsyncpa [#allocation3], 0 }
  0x10   :  { %21 = vsyncpa [#allocation3 + $0x1], 0 }
  0x11   :  { %22 = vsyncpa [#allocation6], 0 }
  0x12   :  { %24 = vsyncpa [#allocation6 + $0x1], 0 }
  0x13   :  { %25 = vsyncpa [#allocation9], 0 }
  0x14   :  { %27 = vsyncpa [#allocation9 + $0x1], 0 }
  0x15   :  { %28 = vsyncpa [#allocation12], 0 }
  0x16   :  { %30 = vsyncpa [#allocation12 + $0x1], 0 }
  0x17   :  { %31 = vsyncpa [#allocation4], 0 }
  0x18   :  { %33 = vsyncpa [#allocation4 + $0x1], 0 }
  0x19   :  { %34 = vsyncpa [#allocation16], 0 }
  0x1a   :  { %36 = vsyncpa [#allocation16 + $0x1], 0  ;;  %s3989_s25 = smov 0   ;;  %s3991_s26 = smov 0  }
  0x1b   :  { %s3993_s27 = smov 0   ;;  %s3995_s28 = smov 0  }
  0x1c   :  { %s3997_s29 = smov 0   ;;  %s3999_s30 = smov 0  }
  0x1d   :  { %s4001_s14 = smov 0   ;;  %s4003_s15 = smov 0  }
  0x1e   :  { %s4005_s16 = smov 0   ;;  %s4007_s17 = smov 0  }
  0x1f   :  { %s4009_s18 = smov 0  }
  0x20 LB: > { %4756 = sst [smem:[#allocation25_spill]] %s3850_s26  ;;  %p69_p0 = scmp.eq.s32.totalorder %s3886_s18, 0  ;;  %s3886_s18 = sphi %s4009_s18, %s42_s18   ;;  %s3882_s17 = sphi %s4007_s17, %s4834_s17   ;;  %s3878_s16 = sphi %s4005_s16, %s4833_s16   ;;  %s3874_s15 = sphi %s4003_s15, %s4832_s15   ;;  %s3870_s14 = sphi %s4001_s14, %s4831_s14   ;;  %s3866_s30 = sphi %s3999_s30, %s4830_s30   ;;  %s3862_s29 = sphi %s3997_s29, %s4829_s29   ;;  %s3858_s28 = sphi %s3995_s28, %s4828_s28   ;;  %s3854_s27 = sphi %s3993_s27, %s4827_s27   ;;  %s3850_s26 = sphi %s3991_s26, %s4826_s26   ;;  %s3846_s25 = sphi %s3989_s25, %s4825_s25  }
  0x21   : > { %4757 = sst [smem:[#allocation26_spill]] %s3854_s27  ;;  %p94_p1 = scmp.ne.s32.totalorder %s3854_s27, %s3850_s26 }
  0x22   : > { %4758 = sst [smem:[#allocation27_spill]] %s3858_s28  ;;  %p100_p2 = scmp.ne.s32.totalorder %s3850_s26, %s3846_s25 }
  0x23   : > { %4759 = sst [smem:[#allocation28_spill]] %s3862_s29  ;;  %p4720_p3 = scmp.lt.s32.totalorder %s3886_s18, 8 }
  0x24   : > { %4760 = sst [smem:[#allocation29_spill]] %s3866_s30  ;;  %p96_p4 = por %p94_p1, %p69_p0 }
  0x25   : > { %4761 = sst [smem:[#allocation30_spill]] %s3870_s14  ;;  %s4054_s20 = sand.u32 1, %s3886_s18  }
  0x26   : > { %4762 = sst [smem:[#allocation31_spill]] %s3874_s15  ;;  %s4057_s21 = sand.u32 1, %s3854_s27  }
  0x27   : > { %4763 = sst [smem:[#allocation32_spill]] %s3878_s16  ;;  %s3162_s22 = smul.u32 192, %s4057_s21 }
  0x28   : > { %4764 = sst [smem:[#allocation33_spill]] %s3882_s17  ;;  %p4062_p5 = pnand %p4720_p3, %p96_p4 }
  0x29   : > { %4765 = sst [smem:[#allocation34_spill]] %s3886_s18  ;;  %s3163_s24 = smul.u32 3072, %s3878_s16 }
  0x2a   : > { %s4767_s1 = sld [smem:[#allocation43_spill]]  ;;  %s461_s15 = scalar_lea.vmem [#allocation5], %s3162_s22 }
  0x2b   : > { %s468_s11 = sshll.u32 %s461_s15, 4  ;;  %s4718_s10 = scalar_lea.sflag [#allocation6], %s4054_s20  ;;  %s469_s11 = int_to_ptr.vmem [resolvable:$true] %s468_s11 }
  0x2c   : > { %p4073_p6 = pneg %p4062_p5  ;;  %s3567_s5 = scalar_lea.vmem %s469_s11, 3072 }
  0x2d   : > { %p3568_p7 = scmp.ne.s32.totalorder %s469_s11, %s3567_s5  ;;  %s3888_s3 = smov [#allocation5]  }
  0x2e   : > { %s3572_s14 = sshll.u32 %s3888_s3, 4  ;;  %s3573_s14 = int_to_ptr.vmem [resolvable:$false] %s3572_s14 }
  0x2f   : > { %p3570_p8 = pnand %p3568_p7, %p4073_p6  ;;  %s3574_s13 = scalar_lea.vmem %s3573_s14, 6144 }
  0x30   : > { %s467_s12 = scalar_lea.hbm %s4767_s1, %s3163_s24  ;;  %p3575_p10 = scmp.lt.s32.totalorder %s469_s11, %s3573_s14 }
  0x31   : > { %p3571_p9 = pneg %p3570_p8  ;;  %p3576_p11 = scmp.lt.s32.totalorder %s3574_s13, %s3567_s5 }
  0x33   : > { %p3577_p12 = por %p3576_p11, %p3575_p10 }
  0x35   : > { %p3578_p13 = pnand %p3577_p12, %p3571_p9 }
  0x37   : > { %3581 = shalt.err (!%p3578_p13)
}
  0x38   : > { %s3889_s15 = smov 192   ;;  %s3890_s19 = smov 12  }
  0x39   : > { %3196 = dma.hbm_to_vmem [thread:$0]  (!%p4062_p5), %s467_s12, 3072, %s469_s11, %s4718_s10, %s3889_s15, %s3889_s15, %s3890_s19  }
  0x3a   : > { %p2857_p1 = scmp.ge.s32.totalorder %s3886_s18, 1  ;;  %p605_p4 = scmp.lt.s32.totalorder %s3886_s18, 9 }
  0x3b   : > { %s2847_s5 = sshll.u32 %s3878_s16, 4  ;;  %s4771_s4 = sld [smem:[#allocation46_spill]] }
  0x3c   : > { %p4085_p7 = pnand %p2857_p1, %p605_p4  ;;  %s508_s13 = scalar_lea.vmem [#allocation8], %s4057_s21 }
  0x3d   : > { %s515_s1 = sshll.u32 %s508_s13, 4  ;;  %s4724_s8 = scalar_lea.sflag [#allocation9], %s4054_s20  ;;  %s516_s1 = int_to_ptr.vmem [resolvable:$true] %s515_s1 }
  0x3e   : > { %s4769_s3 = scalar_select %p4085_p7, 1, 0 }
  0x3f   : > { %s3595_s6 = scalar_lea.vmem %s516_s1, 16  ;;  %s3891_s11 = smov [#allocation8]  }
  0x40   : > { %4770 = sst [smem:[#allocation35_spill]] %s4769_s3  ;;  %p3596_p8 = scmp.ne.s32.totalorder %s516_s1, %s3595_s6 }
  0x41   : > { %s513_s24 = scalar_lea.hbm %s4771_s4, %s2847_s5  ;;  %s3600_s12 = sshll.u32 %s3891_s11, 4  ;;  %s3601_s12 = int_to_ptr.vmem [resolvable:$false] %s3600_s12 }
  0x42   : > { %p3598_p9 = pnand %p3596_p8, %p4073_p6  ;;  %s3602_s15 = scalar_lea.vmem %s3601_s12, 32 }
  0x43   : > { %p3603_p11 = scmp.lt.s32.totalorder %s516_s1, %s3601_s12  ;;  %p3604_p12 = scmp.lt.s32.totalorder %s3602_s15, %s3595_s6 }
  0x44   : > { %p3599_p10 = pneg %p3598_p9 }
  0x45   : > { %p3605_p13 = por %p3604_p12, %p3603_p11 }
  0x47   : > { %p3606_p1 = pnand %p3605_p13, %p3599_p10 }
  0x49   : > { %3609 = shalt.err (!%p3606_p1)
}
  0x4a   : > { %3202 = dma.hbm_to_vmem [thread:$0]  (!%p4062_p5), %s513_s24, 16, %s516_s1, %s4724_s8  }
  0x4b   : > { %s2851_s19 = sshll.u32 %s4057_s21, 2  ;;  %s2992_s5 = sshll.u32 %s3878_s16, 6 }
  0x4c   : > { %s4772_s7 = sld [smem:[#allocation49_spill]]  ;;  %s553_s11 = scalar_lea.vmem [#allocation11], %s2851_s19 }
  0x4d   : > { %s561_s6 = sshll.u32 %s553_s11, 4  ;;  %s4722_s12 = scalar_lea.sflag [#allocation12], %s4054_s20  ;;  %s562_s6 = int_to_ptr.vmem [resolvable:$true] %s561_s6 }
  0x4e   : > { %s3623_s15 = scalar_lea.vmem %s562_s6, 64  ;;  %s3892_s10 = smov [#allocation11]  }
  0x4f   : > { %p3624_p4 = scmp.ne.s32.totalorder %s562_s6, %s3623_s15  ;;  %s3628_s4 = sshll.u32 %s3892_s10, 4  ;;  %s3629_s4 = int_to_ptr.vmem [resolvable:$false] %s3628_s4 }
  0x50   : > { %s3630_s3 = scalar_lea.vmem %s3629_s4, 128  ;;  %p3631_p10 = scmp.lt.s32.totalorder %s562_s6, %s3629_s4 }
  0x51   : > { %p3626_p8 = pnand %p3624_p4, %p4073_p6  ;;  %p3632_p11 = scmp.lt.s32.totalorder %s3630_s3, %s3623_s15 }
  0x52   : > { %s559_s13 = scalar_lea.hbm %s4772_s7, %s2992_s5 }
  0x53   : > { %p3627_p9 = pneg %p3626_p8  ;;  %p3633_p12 = por %p3632_p11, %p3631_p10 }
  0x55   : > { %p3634_p13 = pnand %p3633_p12, %p3627_p9 }
  0x57   : > { %3637 = shalt.err (!%p3634_p13)
}
  0x58   : > { %3208 = dma.hbm_to_vmem [thread:$0]  (!%p4062_p5), %s559_s13, 64, %s562_s6, %s4722_s12  }
  0x59   : > { %s4114_s1 = sadd.s32 4294967295, %s3886_s18   ;;  %s2837_s4 = sadd.s32 4294967294, %s3886_s18  }
  0x5a   : > { %s51_s10 = sadd.s32 1, %s3878_s16  ;;  %s54_s3 = sadd.s32 1, %s3882_s17 }
  0x5b   : > { %p52_p1 = scmp.ge.s32.totalorder %s51_s10, 4  ;;  %s61_s24 = sadd.s32 1, %s3866_s30 }
  0x5c   : > { %p68_p4 = scmp.ne.s32.totalorder %s3866_s30, %s3862_s29  ;;  %p4721_p8 = scmp.ne.s32.totalorder %s3862_s29, %s3858_s28 }
  0x5d   : > { %s4836_s10 = smov (%p52_p1, %s51_s10), 0  ;;  %s4838_s3 = smov (!%p52_p1, %s54_s3), %s3882_s17 }
  0x5e   : > { %4773 = sst [smem:[#allocation36_spill]] %s4836_s10  ;;  %p4132_p9 = por %p69_p0, %p68_p4 }
  0x5f   : > { %p75_p10 = scmp.eq.s32.totalorder %s4114_s1, 0  ;;  %p56_p11 = scmp.ge.s32.totalorder %s4838_s3, 2 }
  0x60   : > { %s84_s5 = ssub.s32 %s3878_s16, %s4836_s10  ;;  %s4777_s22 = sadd.s32 1, %s3854_s27 }
  0x61   : > { %p4142_p12 = por %p75_p10, %p4721_p8  ;;  %p85_p13 = scmp.eq.s32.totalorder %s84_s5, 0 }
  0x62   : > { %s4840_s3 = smov (%p56_p11, %s4838_s3), 0  ;;  %p4158_p0 = por %p100_p2, %p75_p10 }
  0x63   : > { %s4775_s14 = scalar_select %p4142_p12, 1, 0 }
  0x64   : > { %4776 = sst [smem:[#allocation37_spill]] %s4840_s3  ;;  %s58_s11 = ssub.s32 %s3882_s17, %s4840_s3 }
  0x65   : > { %s4151_s13 = scalar_select %p85_p13, %s3854_s27, %s4777_s22  }
  0x66   : > { %p59_p1 = scmp.eq.s32.totalorder %s58_s11, 0  ;;  %p384_p3 = scmp.eq.s32.totalorder %s4114_s1, 7 }
  0x67   : > { %4778 = sst [smem:[#allocation38_spill]] %s4151_s13  ;;  %p390_p8 = scmp.eq.s32.totalorder %s2837_s4, 7 }
  0x68   : > { %s436_s15 = sand.u32 1, %s3866_s30   ;;  %p4170_p11 = por %p384_p3, %p68_p4 }
  0x69   : > { %s4165_s5 = scalar_select %p59_p1, %s3866_s30, %s61_s24  }
  0x6a   : > { %s4781_s12 = scalar_select %p4170_p11, 1, 0 }
  0x6b   : > { %4780 = sst [smem:[#allocation39_spill]] %s4165_s5  ;;  %p4783_p13 = scmp.ne.s32.totalorder %s3862_s29, %s3858_s28 }
  0x6c   : > { %4782 = sst [smem:[#allocation40_spill]] %s4781_s12  ;;  %s2840_s25 = sshll.u32 %s436_s15, 4 }
  0x6d   : > { %p4177_p12 = por %p390_p8, %p4783_p13  ;;  %s2989_s8 = sshll.u32 %s3882_s17, 8 }
  0x6e   : > { %s4786_s0 = sld [smem:[#allocation42_spill]]  ;;  %s440_s4 = scalar_lea.vmem [#allocation2], %s2840_s25 }
  0x6f   : > { %s4784_s22 = scalar_select %p4177_p12, 1, 0 }
  0x70   : > { %s447_s10 = sshll.u32 %s440_s4, 4  ;;  %p4787_p2 = scmp.lt.s32.totalorder %s3886_s18, 8  ;;  %s448_s10 = int_to_ptr.vmem [resolvable:$true] %s447_s10 }
  0x71   : > { %4785 = sst [smem:[#allocation41_spill]] %s4784_s22  ;;  %s2844_s5 = sshll.u32 %s4057_s21, 6 }
  0x72   : > { %p4189_p3 = pnand %p4787_p2, %p4132_p9  ;;  %s437_s30 = scalar_lea.sflag [#allocation3], %s436_s15 }
  0x73   : > { %s3651_s13 = scalar_lea.vmem %s448_s10, 256  ;;  %s3893_s7 = smov [#allocation2]  }
  0x74   : > { %s446_s11 = scalar_lea.hbm %s4786_s0, %s2989_s8  ;;  %p3640_p4 = pneg %p4189_p3 }
  0x75   : > { %p3652_p8 = scmp.ne.s32.totalorder %s448_s10, %s3651_s13  ;;  %s3656_s8 = sshll.u32 %s3893_s7, 4  ;;  %s3657_s8 = int_to_ptr.vmem [resolvable:$false] %s3656_s8 }
  0x76   : > { %s3658_s3 = scalar_lea.vmem %s3657_s8, 512  ;;  %p3659_p13 = scmp.lt.s32.totalorder %s448_s10, %s3657_s8 }
  0x77   : > { %p3654_p10 = pnand %p3652_p8, %p3640_p4  ;;  %p3660_p12 = scmp.lt.s32.totalorder %s3658_s3, %s3651_s13 }
  0x79   : > { %p3655_p1 = pneg %p3654_p10  ;;  %p3661_p11 = por %p3660_p12, %p3659_p13 }
  0x7b   : > { %p3662_p9 = pnand %p3661_p11, %p3655_p1 }
  0x7d   : > { %3665 = shalt.err (!%p3662_p9)
}
  0x7e   : > { %s3894_s19 = smov 128   ;;  %s3895_s15 = smov 8  }
  0x7f   : > { %3193 = dma.hbm_to_vmem [thread:$0]  (!%p4189_p3), %s446_s11, 256, %s448_s10, %s437_s30, %s3894_s19, %s3894_s19, %s3895_s15  }
  0x80   : > { %s2990_s25 = sshll.u32 %s3878_s16, 10  ;;  %s4789_s2 = sld [smem:[#allocation44_spill]] }
  0x81   : > { %s482_s17 = scalar_lea.vmem [#allocation7], %s2844_s5  ;;  %s2848_s13 = sshll.u32 %s4057_s21, 8 }
  0x82   : > { %s489_s27 = sshll.u32 %s482_s17, 4  ;;  %s3896_s3 = smov [#allocation7]   ;;  %s490_s27 = int_to_ptr.vmem [resolvable:$true] %s489_s27 }
  0x83   : > { %s3679_s8 = scalar_lea.vmem %s490_s27, 1024  ;;  %s3684_s22 = sshll.u32 %s3896_s3, 4  ;;  %s3685_s22 = int_to_ptr.vmem [resolvable:$false] %s3684_s22 }
  0x84   : > { %p3680_p12 = scmp.ne.s32.totalorder %s490_s27, %s3679_s8  ;;  %s3686_s28 = scalar_lea.vmem %s3685_s22, 2048 }
  0x85   : > { %p3687_p4 = scmp.lt.s32.totalorder %s490_s27, %s3685_s22  ;;  %p3688_p3 = scmp.lt.s32.totalorder %s3686_s28, %s3679_s8 }
  0x86   : > { %s488_s7 = scalar_lea.hbm %s4789_s2, %s2990_s25  ;;  %p3682_p11 = pnand %p3680_p12, %p4073_p6 }
  0x87   : > { %p3689_p8 = por %p3688_p3, %p3687_p4 }
  0x88   : > { %p3683_p2 = pneg %p3682_p11 }
  0x8a   : > { %p3690_p10 = pnand %p3689_p8, %p3683_p2 }
  0x8c   : > { %3693 = shalt.err (!%p3690_p10)
}
  0x8d   : > { %s4733_s0 = smov 64   ;;  %s3898_s30 = smov 4  }
  0x8e   : > { %s4790_s17 = scalar_lea.sflag [#allocation6], %s4054_s20  ;;  %s2991_s10 = sshll.u32 %s3878_s16, 12 }
  0x8f   : > { %3199 = dma.hbm_to_vmem [thread:$0]  (!%p4062_p5), %s488_s7, 1024, %s490_s27, %s4790_s17, %s4733_s0, %s4733_s0, %s3898_s30  }
  0x90   : > { %s4791_s28 = sld [smem:[#allocation48_spill]]  ;;  %s532_s24 = scalar_lea.vmem [#allocation10], %s2848_s13 }
  0x91   : > { %s539_s19 = sshll.u32 %s532_s24, 4  ;;  %s3899_s25 = smov [#allocation10]   ;;  %s540_s19 = int_to_ptr.vmem [resolvable:$true] %s539_s19 }
  0x92   : > { %s3707_s15 = scalar_lea.vmem %s540_s19, 4096  ;;  %s3712_s4 = sshll.u32 %s3899_s25, 4  ;;  %s3713_s4 = int_to_ptr.vmem [resolvable:$false] %s3712_s4 }
  0x93   : > { %p3708_p1 = scmp.ne.s32.totalorder %s540_s19, %s3707_s15  ;;  %s3714_s8 = scalar_lea.vmem %s3713_s4, 8192 }
  0x94   : > { %p3715_p12 = scmp.lt.s32.totalorder %s540_s19, %s3713_s4  ;;  %p3716_p11 = scmp.lt.s32.totalorder %s3714_s8, %s3707_s15 }
  0x95   : > { %p3710_p13 = pnand %p3708_p1, %p4073_p6 }
  0x96   : > { %s538_s11 = scalar_lea.hbm %s4791_s28, %s2991_s10  ;;  %p3717_p2 = por %p3716_p11, %p3715_p12 }
  0x97   : > { %p3711_p9 = pneg %p3710_p13 }
  0x99   : > { %p3718_p4 = pnand %p3717_p2, %p3711_p9 }
  0x9b   : > { %3721 = shalt.err (!%p3718_p4)
}
  0x9c   : > { %s3900_s27 = smov 256   ;;  %s3901_s7 = smov 16  }
  0x9d   : > { %s4792_s3 = scalar_lea.sflag [#allocation9], %s4054_s20  ;;  %s4793_s22 = sld [smem:[#allocation50_spill]] }
  0x9e   : > { %3205 = dma.hbm_to_vmem [thread:$0]  (!%p4062_p5), %s538_s11, 4096, %s540_s19, %s4792_s3, %s3900_s27, %s3900_s27, %s3901_s7  }
  0x9f   : > { %s572_s24 = scalar_lea.vmem [#allocation13], %s2848_s13  ;;  %s3902_s4 = smov [#allocation13]  }
  0xa0   : > { %s579_s25 = sshll.u32 %s572_s24, 4  ;;  %s3740_s8 = sshll.u32 %s3902_s4, 4  ;;  %s580_s25 = int_to_ptr.vmem [resolvable:$true] %s579_s25  ;;  %s3741_s8 = int_to_ptr.vmem [resolvable:$false] %s3740_s8 }
  0xa1   : > { %s3735_s15 = scalar_lea.vmem %s580_s25, 4096  ;;  %s3742_s0 = scalar_lea.vmem %s3741_s8, 8192 }
  0xa2   : > { %p3736_p3 = scmp.ne.s32.totalorder %s580_s25, %s3735_s15  ;;  %p3743_p1 = scmp.lt.s32.totalorder %s580_s25, %s3741_s8 }
  0xa3   : > { %s578_s28 = scalar_lea.hbm %s4793_s22, %s2991_s10  ;;  %p3744_p13 = scmp.lt.s32.totalorder %s3742_s0, %s3735_s15 }
  0xa4   : > { %p3738_p8 = pnand %p3736_p3, %p4073_p6 }
  0xa5   : > { %p3745_p9 = por %p3744_p13, %p3743_p1 }
  0xa6   : > { %p3739_p10 = pneg %p3738_p8 }
  0xa8   : > { %p3746_p12 = pnand %p3745_p9, %p3739_p10 }
  0xaa   : > { %3749 = shalt.err (!%p3746_p12)
}
  0xab   : > { %s4794_s21 = smov 64   ;;  %s4795_s13 = scalar_lea.sflag [#allocation12], %s4054_s20 }
  0xac   : > { %3211 = dma.hbm_to_vmem [thread:$0]  (!%p4062_p5), %s578_s28, 4096, %s580_s25, %s4795_s13, %s4794_s21, %s4794_s21, %s3898_s30  }
  0xad   : > { %609 = sbr.rel (%p4085_p7) target bundleno = 2714 (0xa9a), region = 68  ;;  %s4241_s10 = sand.u32 (!%p4085_p7), 1, %s3862_s29  }
  0xae   : > { %s4734_s0 = sshll.u32 (!%p4085_p7), %s4241_s10, 4  ;;  %s612_s11 = scalar_lea.sflag (!%p4085_p7), [#allocation3], %s4241_s10 }
  0xaf   : > { %s4247_s23 = scalar_lea.vmem (!%p4085_p7), [#allocation2], %s4734_s0  ;;  %p4797_p6 = scmp.ne.s32.totalorder (!%p4085_p7), %s4775_s14, 0 }
  0xb2   : > { %3821 = dma.done.wait (%p4797_p6), %s612_s11, 256  }
  0xb3   : > { %3823 = vsyncadd (%p4797_p6), %s612_s11, 4294967040  ;;  %s620_s20 = sand.u32 1, %s4114_s1   ;;  %s4255_s30 = sand.u32 1, %s3850_s26  }
  0xb4   : > { %s3164_s19 = smul.u32 192, %s4255_s30  ;;  %s621_s27 = scalar_lea.sflag [#allocation6], %s620_s20 }
  0xb6   : > { %s4258_s7 = scalar_lea.vmem [#allocation5], %s3164_s19 }
  0xb7   : > { %3825 = dma.done.wait (%p4158_p0), %s621_s27, 4096  }
  0xb8   : > { %3827 = vsyncadd (%p4158_p0), %s621_s27, 4294963200  ;;  %s2859_s14 = sshll.u32 %s4255_s30, 6  ;;  %s639_s17 = scalar_lea.sflag [#allocation9], %s620_s20 }
  0xb9   : > { %s4265_s3 = scalar_lea.vmem [#allocation7], %s2859_s14 }
  0xba   : > { %3829 = dma.done.wait (%p4158_p0), %s639_s17, 4112  }
  0xbb   : > { %3831 = vsyncadd (%p4158_p0), %s639_s17, 4294963184  ;;  %s2860_s5 = sshll.u32 %s4255_s30, 8  ;;  %s2861_s22 = sshll.u32 %s4255_s30, 2 }
  0xbc   : > { %s4274_s28 = scalar_lea.vmem [#allocation10], %s2860_s5  ;;  %s656_s24 = scalar_lea.sflag [#allocation12], %s620_s20 }
  0xbd   : > { %s4276_s25 = scalar_lea.vmem [#allocation11], %s2861_s22 }
  0xbe   : > { %3833 = dma.done.wait (%p4158_p0), %s656_s24, 4160  }
  0xbf   : > { %3835 = vsyncadd (%p4158_p0), %s656_s24, 4294963136  ;;  %s4798_s15 = sld [smem:[#allocation30_spill]]  ;;  %s3165_s4 = smul.u32 48, %s4241_s10 }
  0xc0   : > { %s4800_s19 = sld [smem:[#allocation47_spill]]  ;;  %s4307_s18 = scalar_lea.vmem [#allocation13], %s2860_s5 }
  0xc1   : > { %s4801_s22 = sld [smem:[#allocation51_spill]]  ;;  %s4804_s12 = sshll.u32 %s4241_s10, 4 }
  0xc2   : > { %s4802_s2 = sld [smem:[#allocation52_spill]]  ;;  %s4311_s9 = scalar_lea.vmem [#allocation14], %s4804_s12 }
  0xc3   : > { %s4803_s21 = sld [smem:[#allocation53_spill]]  ;;  %s4313_s11 = scalar_lea.vmem [#allocation15], %s3165_s4 }
  0xc5   : > { %p760_p5 = scmp.lt.s32.totalorder %s4798_s15, 3  ;;  %p2864_p7 = scmp.ne.s32.totalorder %s4798_s15, 0 }
  0xc7   : > { %s4285_s8 = scalar_select %p760_p5, %s4798_s15, 3 }
  0xc8   : > { %779 = sbr.rel (%p2864_p7) target bundleno = 207 (0xcf), region = 100 }
  0xc9   : > { %s765_s27 = scalar_lea.vmem %s4800_s19, %s4285_s8  ;;  %s768_s24 = scalar_lea.vmem %s4801_s22, %s4285_s8 }
  0xca   : > { %s771_s16 = scalar_lea.vmem %s4802_s2, %s4285_s8  ;;  %s774_s13 = scalar_lea.vmem %s4803_s21, %s4285_s8 }
  0xcd   : > { %v780_v0 = vld [vmem:[%s4247_s23] sm:$0xff]  ;;  %v781_v1 = vld [vmem:[%s4247_s23 + $0x8] sm:$0xff] }
  0xce   : > { %782 = vst [vmem:[%s4311_s9] sm:$0xff] %v780_v0  ;;  %783 = vst [vmem:[%s4311_s9 + $0x8] sm:$0xff] %v781_v1 }
  0xcf PF: > { %v3392_v2 = vld [vmem:[%s4258_s7 + $0xac] ss:$12 sps:$4 sm:$0xff]   ;;  %v3394_v3 = vld [vmem:[%s4258_s7 + $0xa8] ss:$12 sps:$4 sm:$0xff]   ;;  %v3903_v4 = vmov 0   ;;  %v3904_v5 = vmov 0.0  }
  0xd0   : > { %979 = vmatprep.mubr.bf16.mxu0 %v3903_v4  ;;  %3074 = vmatprep.subr.bf16.mxu1 %v3904_v5  ;;  %v3395_v6 = vld [vmem:[%s4258_s7 + $0x94] ss:$12 sps:$4 sm:$0xff]   ;;  %v3397_v7 = vld [vmem:[%s4258_s7 + $0x90] ss:$12 sps:$4 sm:$0xff]   ;;  %v3400_v9 = vld [vmem:[%s4258_s7 + $0x78] ss:$12 sps:$4 sm:$0xff]  }
  0xd1   : > { %947 = vmatprep.subr.bf16.mxu0 %v3392_v2  ;;  %v3398_v8 = vld [vmem:[%s4258_s7 + $0x7c] ss:$12 sps:$4 sm:$0xff]   ;;  %v3401_v10 = vld [vmem:[%s4258_s7 + $0x64] ss:$12 sps:$4 sm:$0xff]   ;;  %v3403_v11 = vld [vmem:[%s4258_s7 + $0x60] ss:$12 sps:$4 sm:$0xff]  }
  0xd2   : > { %948 = vmatpush1.bf16.msra.mxu0 %v3394_v3  ;;  %v3404_v12 = vld [vmem:[%s4258_s7 + $0x4c] ss:$12 sps:$4 sm:$0xff]   ;;  %v3416_v13 = vld [vmem:[%s4258_s7 + $0xb0] ss:$12 sps:$4 sm:$0xff]   ;;  %v3406_v15 = vld [vmem:[%s4258_s7 + $0x48] ss:$12 sps:$4 sm:$0xff]  }
  0xd3   : > { %949 = vmatprep.subr.bf16.mxu0 %v3395_v6  ;;  %3075 = vmatpush3.bf16.msra.mxu1 %v3416_v13  ;;  %v3417_v14 = vld [vmem:[%s4258_s7 + $0x98] ss:$12 sps:$4 sm:$0xff]   ;;  %v3407_v16 = vld [vmem:[%s4258_s7 + $0x34] ss:$12 sps:$4 sm:$0xff]   ;;  %v3409_v17 = vld [vmem:[%s4258_s7 + $0x30] ss:$12 sps:$4 sm:$0xff]  }
  0xd4   : > { %3076 = vmatprep.subr.bf16.mxu1 %v3904_v5  ;;  %v3418_v18 = vld [vmem:[%s4258_s7 + $0x80] ss:$12 sps:$4 sm:$0xff]   ;;  %v3410_v19 = vld [vmem:[%s4258_s7 + $0x1c] ss:$12 sps:$4 sm:$0xff]   ;;  %v3412_v21 = vld [vmem:[%s4258_s7 + $0x18] ss:$12 sps:$4 sm:$0xff]  }
  0xd5   : > { %v3419_v20 = vld [vmem:[%s4258_s7 + $0x68] ss:$12 sps:$4 sm:$0xff]   ;;  %v3413_v22 = vld [vmem:[%s4258_s7 + $0x4] ss:$12 sps:$4 sm:$0xff]   ;;  %v3415_v24 = vld [vmem:[%s4258_s7] ss:$12 sps:$4 sm:$0xff]  }
  0xd6   : > { %950 = vmatpush1.bf16.msra.mxu0 %v3397_v7  ;;  %v3420_v23 = vld [vmem:[%s4258_s7 + $0x50] ss:$12 sps:$4 sm:$0xff]   ;;  %v3421_v27 = vld [vmem:[%s4258_s7 + $0x38] ss:$12 sps:$4 sm:$0xff]   ;;  %v3422_v29 = vld [vmem:[%s4258_s7 + $0x20] ss:$12 sps:$4 sm:$0xff]  }
  0xd7   : > { %951 = vmatprep.subr.bf16.mxu0 %v3398_v8  ;;  %3077 = vmatpush3.bf16.msra.mxu1 %v3417_v14  ;;  %v4349_v25 = vld [vmem:[%s4311_s9] sm:$0xff]  ;;  %v4352_v26 = vld [vmem:[%s4311_s9 + $0x8] sm:$0xff]  ;;  %vm3905_vm0 = vmmov 0   ;;  %vm1103_vm1 = vcmask 261120   ;;  %s3906_s2 = smov 64   ;;  %s3907_s26 = smov 96  }
  0xd8   : > { %3078 = vmatprep.subr.bf16.mxu1 %v3904_v5  ;;  %v786_v28 = vpack.c.bf16 %v4352_v26, %v4349_v25  ;;  %v3423_v30 = vld [vmem:[%s4258_s7 + $0x8] ss:$12 sps:$4 sm:$0xff]   ;;  %3090 = vmatprep.mubr.msk.bf16.mxu1 %vm3905_vm0, %v3904_v5  ;;  %s3908_s29 = smov 32   ;;  %vm1311_vm3 = vcmask 130048   ;;  %vm1606_vm5 = vcmask 523264   ;;  %vm1609_vm6 = vcmask 785408  }
  0xd9   : > { %s4805_s23 = sld [smem:[#allocation45_spill]] }
  0xda   : > { %952 = vmatpush1.bf16.msra.mxu0 %v3400_v9 }
  0xdb   : > { %953 = vmatprep.subr.bf16.mxu0 %v3401_v10  ;;  %3079 = vmatpush3.bf16.msra.mxu1 %v3418_v18  ;;  %v1292_v10 = vlaneseq }
  0xdc   : > { %3080 = vmatprep.subr.bf16.mxu1 %v3904_v5 }
  0xde   : > { %954 = vmatpush1.bf16.msra.mxu0 %v3403_v11  ;;  %v4404_v11 = vshrl.u32 %v1292_v10, 7 }
  0xdf   : > { %955 = vmatprep.subr.bf16.mxu0 %v3404_v12  ;;  %3081 = vmatpush3.bf16.msra.mxu1 %v3419_v20  ;;  %v1296_v12 = vand.u32 127, %v1292_v10  ;;  %s4806_s7 = scalar_lea.vmem %s4805_s23, %s4285_s8 }
  0xe0   : > { %3082 = vmatprep.subr.bf16.mxu1 %v3904_v5  ;;  %v1294_v13 = vadd.s32 8, %v4404_v11 }
  0xe1   : > { %vm1297_vm2 = vcmp.gt.s32.totalorder %v1296_v12, %v4404_v11 }
  0xe2   : > { %956 = vmatpush1.bf16.msra.mxu0 %v3406_v15  ;;  %vm1298_vm4 = vcmp.gt.s32.totalorder %v1296_v12, %v1294_v13 }
  0xe3   : > { %957 = vmatprep.subr.bf16.mxu0 %v3407_v16  ;;  %3083 = vmatpush3.bf16.msra.mxu1 %v3420_v23 }
  0xe4   : > { %3084 = vmatprep.subr.bf16.mxu1 %v3904_v5 }
  0xe6   : > { %958 = vmatpush1.bf16.msra.mxu0 %v3409_v17 }
  0xe7   : > { %959 = vmatprep.subr.bf16.mxu0 %v3410_v19  ;;  %3085 = vmatpush3.bf16.msra.mxu1 %v3421_v27 }
  0xe8   : > { %3086 = vmatprep.subr.bf16.mxu1 %v3904_v5 }
  0xea   : > { %960 = vmatpush1.bf16.msra.mxu0 %v3412_v21 }
  0xeb   : > { %961 = vmatprep.subr.bf16.mxu0 %v3413_v22  ;;  %3087 = vmatpush3.bf16.msra.mxu1 %v3422_v29 }
  0xec   : > { %3088 = vmatprep.subr.bf16.mxu1 %v3904_v5 }
  0xee   : > { %962 = vmatpush1.bf16.msra.mxu0 %v3415_v24 }
  0xef   : > { %3118 = vmatprep.subr.bf16.mxu0 %v3904_v5  ;;  %3089 = vmatpush3.bf16.msra.mxu1 %v3423_v30 }
  0xf0   : > { %3094 = vmatprep.subr.bf16.mxu1 %v3904_v5 }
  0xf1   : > { %980 = vmatmul.mubr.bf16.vlgmr.msra.gmra.mxu0 %v786_v28 }
  0xf2   : > { %3120 = vmatprep.mubr.msk.bf16.mxu0 %vm3905_vm0, %v3904_v5  ;;  %3091 = vmatmul.mubr.bf16.vlgmr.msra.gmra.mxu1 %v786_v28 }
  0xf3   : > { %3096 = vmatprep.mubr.msk.bf16.mxu1 %vm3905_vm0, %v3904_v5 }
 0x1b1   : > { %v981_v31 = vpop.f32.mrf.mxu0 }
 0x1b2   : > { %v4382_v40 = vpop.f32.mrf.mxu1 }
 0x1b3   : > { %v983_v32 = vpop.f32.mrf.mxu0 }
 0x1b4   : > { %v3092_v41 = vpop.f32.mrf.mxu1 }
 0x1b5   : > { %v985_v33 = vpop.f32.mrf.mxu0 }
 0x1b6   : > { %v3347_v38 = vpack.i.bf16 %v985_v33, %v981_v31  ;;  %v1051_v39 = vpack.c.bf16 %v985_v33, %v981_v31  ;;  %v4384_v42 = vpop.f32.mrf.mxu1 }
 0x1b7   : > { %v987_v34 = vpop.f32.mrf.mxu0  ;;  %v1099_v43 = vpack.c.bf16 %v4384_v42, %v4382_v40 }
 0x1b8   : > { %v3342_v35 = vpack.i.bf16 %v987_v34, %v983_v32  ;;  %v1075_v36 = vpack.c.bf16 %v987_v34, %v983_v32  ;;  %v3093_v44 = vpop.f32.mrf.mxu1 }
 0x1b9   : > { %3119 = vmatpush3.bf16.msra.mxu0 %v1099_v43 }
 0x1ba   : > { %3343 = vrot.lane.b32.xlu1 %v3342_v35, %s3906_s2  ;;  %3333 = vrot.lane.b32.xlu0 %v3342_v35, %s3907_s26  ;;  %v1108_v37 = vsel %vm1103_vm1, %v1075_v36, 0 }
 0x1bb   : > { %3095 = vmatpush3.bf16.xpose.msra.mxu1 %v1108_v37  ;;  %3130 = vmatprep.subr.bf16.mxu0 %v3904_v5 }
 0x1bc   : > { %3100 = vmatprep.subr.bf16.mxu1 %v3904_v5 }
 0x1be   : > { %3348 = vrot.lane.b32.xlu1 %v3347_v38, %s3906_s2  ;;  %3338 = vrot.lane.b32.xlu0 %v3347_v38, %s3907_s26 }
 0x1c2   : > { %3358 = vrot.lane.b32.xlu1 %v3347_v38, %s3908_s29  ;;  %3353 = vrot.lane.b32.xlu0 %v3342_v35, %s3908_s29 }
 0x1c3   : > { %3097 = vmatmul.mubr.msk.bf16.vlgmr.msra.gmra.mxu1 %vm1103_vm1, %v1051_v39 }
 0x1c4   : > { %3102 = vmatprep.mubr.msk.bf16.mxu1 %vm3905_vm0, %v3904_v5 }
 0x22c   : > { %v3334_v45 = vpop.permute.xlu0 %3333  ;;  %v3344_v48 = vpop.permute.xlu1 %3343 }
 0x22d   : > { %v3336_v46 = vunpack.i.h.bf16 %v3334_v45  ;;  %v3335_v47 = vunpack.i.l.bf16 %v3334_v45  ;;  %v3346_v51 = vunpack.i.h.bf16 %v3344_v48  ;;  %v3345_v52 = vunpack.i.l.bf16 %v3344_v48 }
 0x22f   : > { %v1076_v49 = vpack.c.bf16 %v3336_v46, %v3335_v47  ;;  %v1077_v56 = vpack.c.bf16 %v3346_v51, %v3345_v52 }
 0x230   : > { %v3339_v50 = vpop.permute.xlu0 %3338  ;;  %v3349_v59 = vpop.permute.xlu1 %3348 }
 0x231   : > { %v1155_v53 = vsel %vm1103_vm1, %v1076_v49, 0  ;;  %v3341_v54 = vunpack.i.h.bf16 %v3339_v50  ;;  %v3340_v55 = vunpack.i.l.bf16 %v3339_v50  ;;  %v1202_v62 = vsel %vm1103_vm1, %v1077_v56, 0 }
 0x232   : > { %3101 = vmatpush3.bf16.xpose.msra.mxu1 %v1155_v53  ;;  %v3351_v63 = vunpack.i.h.bf16 %v3349_v59  ;;  %v3350_v0 = vunpack.i.l.bf16 %v3349_v59  ;;  %v3362_v53 = vpack.i.bf16 %v4384_v42, %v4382_v40 }
 0x233   : > { %3106 = vmatprep.subr.bf16.mxu1 %v3904_v5  ;;  %v1052_v58 = vpack.c.bf16 %v3341_v54, %v3340_v55 }
 0x234   : > { %v3354_v57 = vpop.permute.xlu0 %3353  ;;  %v1053_v2 = vpack.c.bf16 %v3351_v63, %v3350_v0  ;;  %v3359_v3 = vpop.permute.xlu1 %3358 }
 0x235   : > { %v3356_v60 = vunpack.i.h.bf16 %v3354_v57  ;;  %v3355_v61 = vunpack.i.l.bf16 %v3354_v57  ;;  %v3361_v7 = vunpack.i.h.bf16 %v3359_v3  ;;  %v3360_v8 = vunpack.i.l.bf16 %v3359_v3 }
 0x237   : > { %v1078_v1 = vpack.c.bf16 %v3356_v60, %v3355_v61  ;;  %v1054_v9 = vpack.c.bf16 %v3361_v7, %v3360_v8 }
 0x239   : > { %3103 = vmatmul.mubr.msk.bf16.vlgmr.msra.gmra.mxu1 %vm1103_vm1, %v1052_v58  ;;  %v1249_v6 = vsel %vm1103_vm1, %v1078_v1, 0 }
 0x23a   : > { %3107 = vmatpush3.bf16.xpose.msra.mxu1 %v1202_v62  ;;  %3108 = vmatprep.mubr.msk.bf16.mxu1 %vm3905_vm0, %v3904_v5 }
 0x23b   : > { %3112 = vmatprep.subr.bf16.mxu1 %v3904_v5 }
 0x241   : > { %3109 = vmatmul.mubr.msk.bf16.vlgmr.msra.gmra.mxu1 %vm1103_vm1, %v1053_v2 }
 0x242   : > { %3113 = vmatpush3.bf16.xpose.msra.mxu1 %v1249_v6  ;;  %3114 = vmatprep.mubr.msk.bf16.mxu1 %vm3905_vm0, %v3904_v5 }
 0x243   : > { %3124 = vmatprep.subr.bf16.mxu1 %v3904_v5 }
 0x249   : > { %3115 = vmatmul.mubr.msk.bf16.vlgmr.msra.gmra.mxu1 %vm1103_vm1, %v1054_v9 }
 0x24a   : > { %3126 = vmatprep.mubr.msk.bf16.mxu1 %vm3905_vm0, %v3904_v5 }
 0x283   : > { %v1144_v14 = vpop.f32.mrf.mxu1 }
 0x284   : > { %v1303_v15 = vsel %vm1297_vm2, -1e+30, %v1144_v14 }
 0x285   : > { %v3098_v16 = vpop.f32.mrf.mxu1  ;;  %v1312_v17 = vsel %vm1311_vm3, %v1303_v15, -inf }
 0x286   : > { %1313 = vmax.xlane.f32.xlu0 %v1312_v17 }
 0x287   : > { %v1147_v18 = vpop.f32.mrf.mxu1 }
 0x288   : > { %v1304_v19 = vsel %vm1298_vm4, -1e+30, %v1147_v18 }
 0x289   : > { %v3099_v20 = vpop.f32.mrf.mxu1  ;;  %v1315_v21 = vsel %vm1311_vm3, %v1304_v19, -inf }
 0x28a   : > { %1316 = vmax.xlane.f32.xlu1 %v1315_v21 }
 0x2f9   : > { %v1191_v22 = vpop.f32.mrf.mxu1 }
 0x2fa   : > { %v1305_v23 = vsel %vm1297_vm2, -1e+30, %v1191_v22 }
 0x2fb   : > { %v3104_v24 = vpop.f32.mrf.mxu1  ;;  %v1318_v27 = vsel %vm1311_vm3, %v1305_v23, -inf }
 0x2fc   : > { %1319 = vmax.xlane.f32.xlu0 %v1318_v27 }
 0x2fd   : > { %v1194_v28 = vpop.f32.mrf.mxu1 }
 0x2fe   : > { %v1306_v29 = vsel %vm1298_vm4, -1e+30, %v1194_v28 }
 0x2ff   : > { %v3105_v30 = vpop.f32.mrf.mxu1  ;;  %v1321_v31 = vsel %vm1311_vm3, %v1306_v29, -inf }
 0x300   : > { %1322 = vmax.xlane.f32.xlu0 %v1321_v31 }
 0x301   : > { %v1238_v32 = vpop.f32.mrf.mxu1 }
 0x302   : > { %v1307_v33 = vsel %vm1297_vm2, -1e+30, %v1238_v32 }
 0x303   : > { %v3110_v34 = vpop.f32.mrf.mxu1  ;;  %v1324_v35 = vsel %vm1311_vm3, %v1307_v33, -inf }
 0x304   : > { %1325 = vmax.xlane.f32.xlu1 %v1324_v35 }
 0x305   : > { %v1241_v36 = vpop.f32.mrf.mxu1 }
 0x306   : > { %v1308_v37 = vsel %vm1298_vm4, -1e+30, %v1241_v36 }
 0x307   : > { %v3111_v38 = vpop.f32.mrf.mxu1  ;;  %v1327_v39 = vsel %vm1311_vm3, %v1308_v37, -inf }
 0x308   : > { %1328 = vmax.xlane.f32.xlu0 %v1327_v39 }
 0x309   : > { %v1285_v41 = vpop.f32.mrf.mxu1 }
 0x30a   : > { %v1309_v43 = vsel %vm1297_vm2, -1e+30, %v1285_v41 }
 0x30b   : > { %v3116_v44 = vpop.f32.mrf.mxu1  ;;  %v1330_v45 = vsel %vm1311_vm3, %v1309_v43, -inf }
 0x30c   : > { %1331 = vmax.xlane.f32.xlu1 %v1330_v45 }
 0x30d   : > { %v1288_v46 = vpop.f32.mrf.mxu1 }
 0x30e   : > { %v1310_v47 = vsel %vm1298_vm4, -1e+30, %v1288_v46 }
 0x30f   : > { %v3117_v48 = vpop.f32.mrf.mxu1  ;;  %v1333_v49 = vsel %vm1311_vm3, %v1310_v47, -inf  ;;  %v1314_v55 = vpop.xlane.xlu0 %1313 }
 0x310   : > { %1334 = vmax.xlane.f32.xlu0 %v1333_v49  ;;  %v1336_v57 = vsub.f32 %v1303_v15, %v1314_v55 }
 0x312   : > { %v1344_v58 = vmul.f32 1.442695, %v1336_v57 }
 0x313   : > { %v1317_v50 = vpop.xlane.xlu1 %1316 }
 0x314   : > { %v1337_v51 = vsub.f32 %v1304_v19, %v1317_v50 }
 0x316   : > { %v1346_v52 = vmul.f32 1.442695, %v1337_v51 }
 0x318   : > { %3512 = vpow2.f32 %v1346_v52 }
 0x319   : > { %3514 = vpow2.f32 %v1344_v58 }
 0x31d   : > { %3363 = vrot.lane.b32.xlu1 %v3362_v53, %s3907_s26 }
 0x325   : > { %v4431_v54 = vpop.eup %3512 }
 0x326   : > { %v1363_v56 = vsel %vm1311_vm3, %v4431_v54, 0.0  ;;  %v3515_v59 = vpop.eup %3514 }
 0x327   : > { %1364 = vadd.xlane.f32.xlu0 %v1363_v56  ;;  %v1360_v60 = vsel %vm1311_vm3, %v3515_v59, 0.0 }
 0x341   : > { %1361 = vadd.xlane.f32.xlu1 %v1360_v60 }
 0x385   : > { %v1320_v61 = vpop.xlane.xlu0 %1319 }
 0x386   : > { %v1338_v62 = vsub.f32 %v1305_v23, %v1320_v61 }
 0x388   : > { %v1348_v63 = vmul.f32 1.442695, %v1338_v62 }
 0x389   : > { %v1323_v40 = vpop.xlane.xlu0 %1322 }
 0x38a   : > { %3516 = vpow2.f32 %v1348_v63  ;;  %v1339_v42 = vsub.f32 %v1306_v29, %v1323_v40 }
 0x38c   : > { %v1350_v0 = vmul.f32 1.442695, %v1339_v42 }
 0x38d   : > { %v1326_v1 = vpop.xlane.xlu1 %1325 }
 0x38e   : > { %3518 = vpow2.f32 %v1350_v0  ;;  %v1340_v2 = vsub.f32 %v1307_v33, %v1326_v1 }
 0x390   : > { %v1352_v3 = vmul.f32 1.442695, %v1340_v2 }
 0x391   : > { %v1329_v6 = vpop.xlane.xlu0 %1328 }
 0x392   : > { %3520 = vpow2.f32 %v1352_v3  ;;  %v1341_v7 = vsub.f32 %v1308_v37, %v1329_v6 }
 0x394   : > { %v1354_v8 = vmul.f32 1.442695, %v1341_v7 }
 0x395   : > { %v1332_v9 = vpop.xlane.xlu1 %1331 }
 0x396   : > { %3522 = vpow2.f32 %v1354_v8  ;;  %v1342_v10 = vsub.f32 %v1309_v43, %v1332_v9  ;;  %v3424_v8 = vld [vmem:[%s4265_s3 + $0x38] sm:$0xff]   ;;  %v3425_v9 = vld [vmem:[%s4265_s3 + $0x30] sm:$0xff]  }
 0x397   : > { %v3517_v12 = vpop.eup %3516 }
 0x398   : > { %v1356_v13 = vmul.f32 1.442695, %v1342_v10  ;;  %v1366_v14 = vsel %vm1311_vm3, %v3517_v12, 0.0  ;;  %v3426_v10 = vld [vmem:[%s4265_s3 + $0x28] sm:$0xff]  }
 0x399   : > { %1367 = vadd.xlane.f32.xlu1 %v1366_v14  ;;  %v3364_v15 = vpop.permute.xlu1 %3363  ;;  %v1335_v16 = vpop.xlane.xlu0 %1334 }
 0x39a   : > { %3524 = vpow2.f32 %v1356_v13  ;;  %v3366_v17 = vunpack.i.h.bf16 %v3364_v15  ;;  %v3365_v18 = vunpack.i.l.bf16 %v3364_v15  ;;  %v1343_v19 = vsub.f32 %v1310_v47, %v1335_v16  ;;  %v3427_v16 = vld [vmem:[%s4265_s3 + $0x20] sm:$0xff]  }
 0x39b   : > { %v3519_v20 = vpop.eup %3518 }
 0x39c   : > { %v1100_v21 = vpack.c.bf16 %v3366_v17, %v3365_v18  ;;  %v1358_v22 = vmul.f32 1.442695, %v1343_v19  ;;  %v1369_v23 = vsel %vm1311_vm3, %v3519_v20, 0.0  ;;  %v3428_v17 = vld [vmem:[%s4265_s3 + $0x18] sm:$0xff]  }
 0x39d   : > { %1370 = vadd.xlane.f32.xlu0 %v1369_v23  ;;  %v3430_v23 = vld [vmem:[%s4265_s3 + $0x8] sm:$0xff]  }
 0x39e   : > { %3526 = vpow2.f32 %v1358_v22  ;;  %3125 = vmatpush3.bf16.msra.mxu1 %v1100_v21 }
 0x39f   : > { %v3521_v24 = vpop.eup %3520  ;;  %3136 = vmatprep.subr.bf16.mxu1 %v3904_v5 }
 0x3a0   : > { %v1372_v27 = vsel %vm1311_vm3, %v3521_v24, 0.0 }
 0x3a1   : > { %1373 = vadd.xlane.f32.xlu1 %v1372_v27 }
 0x3a3   : > { %v3523_v28 = vpop.eup %3522 }
 0x3a4   : > { %v1375_v29 = vsel %vm1311_vm3, %v3523_v28, 0.0 }
 0x3a5   : > { %1376 = vadd.xlane.f32.xlu0 %v1375_v29 }
 0x3a7   : > { %v3525_v30 = vpop.eup %3524 }
 0x3a8   : > { %v1378_v31 = vsel %vm1311_vm3, %v3525_v30, 0.0 }
 0x3a9   : > { %1379 = vadd.xlane.f32.xlu1 %v1378_v31 }
 0x3ab   : > { %v3527_v32 = vpop.eup %3526 }
 0x3ac   : > { %v1381_v33 = vsel %vm1311_vm3, %v3527_v32, 0.0 }
 0x3ad   : > { %1382 = vadd.xlane.f32.xlu0 %v1381_v33 }
 0x3b0   : > { %v1365_v34 = vpop.xlane.xlu0 %1364 }
 0x3b1   : > { %3528 = vrcp.f32 %v1365_v34 }
 0x3ba   : > { %3373 = vrot.lane.b32.xlu1 %v3362_v53, %s3908_s29 }
 0x3be   : > { %v3529_v36 = vpop.eup %3528 }
 0x3bf   : > { %v1393_v39 = vmul.f32 %v3529_v36, %v4431_v54 }
 0x3c3   : > { %3368 = vrot.lane.b32.xlu0 %v3362_v53, %s3906_s2 }
 0x3ca   : > { %v1362_v35 = vpop.xlane.xlu1 %1361 }
 0x3cb   : > { %3530 = vrcp.f32 %v1362_v35 }
 0x3d8   : > { %v3531_v37 = vpop.eup %3530 }
 0x3d9   : > { %v1392_v38 = vmul.f32 %v3531_v37, %v3515_v59 }
 0x3db   : > { %v1400_v41 = vpack.c.bf16 %v1393_v39, %v1392_v38 }
 0x3dd   : > { %3121 = vmatmul.mubr.msk.bf16.vlgmr.msra.gmra.mxu0 %vm1311_vm3, %v1400_v41 }
 0x3de   : > { %3132 = vmatprep.mubr.msk.bf16.mxu0 %vm3905_vm0, %v3904_v5 }
 0x422   : > { %v1368_v43 = vpop.xlane.xlu1 %1367 }
 0x423   : > { %3532 = vrcp.f32 %v1368_v43 }
 0x426   : > { %v1371_v44 = vpop.xlane.xlu0 %1370 }
 0x427   : > { %3534 = vrcp.f32 %v1371_v44 }
 0x42a   : > { %v1374_v45 = vpop.xlane.xlu1 %1373 }
 0x42b   : > { %3536 = vrcp.f32 %v1374_v45 }
 0x42e   : > { %v1377_v46 = vpop.xlane.xlu0 %1376 }
 0x42f   : > { %3538 = vrcp.f32 %v1377_v46 }
 0x430   : > { %v3533_v47 = vpop.eup %3532 }
 0x431   : > { %v1394_v50 = vmul.f32 %v3533_v47, %v3517_v12 }
 0x432   : > { %v1380_v48 = vpop.xlane.xlu1 %1379 }
 0x433   : > { %3540 = vrcp.f32 %v1380_v48 }
 0x434   : > { %v3535_v49 = vpop.eup %3534 }
 0x435   : > { %v1395_v51 = vmul.f32 %v3535_v49, %v3519_v20  ;;  %v3429_v20 = vld [vmem:[%s4265_s3 + $0x10] sm:$0xff]  }
 0x436   : > { %v3374_v52 = vpop.permute.xlu1 %3373  ;;  %v1383_v53 = vpop.xlane.xlu0 %1382 }
 0x437   : > { %v3376_v54 = vunpack.i.h.bf16 %v3374_v52  ;;  %v3375_v55 = vunpack.i.l.bf16 %v3374_v52  ;;  %3542 = vrcp.f32 %v1383_v53  ;;  %v1401_v56 = vpack.c.bf16 %v1395_v51, %v1394_v50 }
 0x438   : > { %v3537_v58 = vpop.eup %3536 }
 0x439   : > { %v1102_v57 = vpack.c.bf16 %v3376_v54, %v3375_v55  ;;  %3127 = vmatmul.mubr.msk.bf16.vlgmr.msra.gmra.mxu1 %vm1311_vm3, %v1401_v56  ;;  %v1396_v40 = vmul.f32 %v3537_v58, %v3521_v24  ;;  %v2897_v55 = vld [vmem:[%s4806_s7] ss:$0 sm:$0xff] }
 0x43a   : > { %v3369_v59 = vpop.permute.xlu0 %3368  ;;  %3138 = vmatprep.mubr.msk.bf16.mxu1 %vm3905_vm0, %v3904_v5 }
 0x43b   : > { %v3371_v60 = vunpack.i.h.bf16 %v3369_v59  ;;  %v3370_v61 = vunpack.i.l.bf16 %v3369_v59  ;;  %3137 = vmatpush3.bf16.msra.mxu1 %v1102_v57 }
 0x43c   : > { %v3539_v62 = vpop.eup %3538 }
 0x43d   : > { %v1101_v63 = vpack.c.bf16 %v3371_v60, %v3370_v61  ;;  %v1397_v42 = vmul.f32 %v3539_v62, %v3523_v28  ;;  %v3431_v28 = vld [vmem:[%s4265_s3] sm:$0xff]   ;;  %s4807_s3 = scalar_lea.vmem [#allocation8], %s4255_s30 }
 0x43f   : > { %3131 = vmatpush3.bf16.msra.mxu0 %v1101_v63  ;;  %v1402_v0 = vpack.c.bf16 %v1397_v42, %v1396_v40  ;;  %v3432_v40 = vld [vmem:[%s4274_s28 + $0xe0] ss:$16 sps:$4 sm:$0xff]   ;;  %v3434_v42 = vld [vmem:[%s4274_s28 + $0xe4] ss:$16 sps:$4 sm:$0xff]  }
 0x440   : > { %3142 = vmatprep.subr.bf16.mxu0 %v3904_v5  ;;  %v3541_v1 = vpop.eup %3540  ;;  %1983 = vmatprep.subr.bf16.mxu1 %v3434_v42  ;;  %v3487_v42 = vld [vmem:[%s4307_s18 + $0xb0] sm:$0xff]  }
 0x441   : > { %v1398_v3 = vmul.f32 %v3541_v1, %v3525_v30 }
 0x442   : > { %3133 = vmatmul.mubr.msk.bf16.vlgmr.msra.gmra.mxu0 %vm1311_vm3, %v1402_v0  ;;  %v3437_v0 = vld [vmem:[%s4274_s28 + $0xec] ss:$16 sps:$4 sm:$0xff]  }
 0x443   : > { %3158 = vmatprep.mubr.msk.bf16.mxu0 %vm3905_vm0, %v3904_v5  ;;  %3143 = vmatpush3.bf16.msra.mxu0 %v3424_v8 }
 0x444   : > { %v3543_v2 = vpop.eup %3542  ;;  %3144 = vmatprep.subr.bf16.mxu0 %v3904_v5 }
 0x445   : > { %v1399_v6 = vmul.f32 %v3543_v2, %v3527_v32 }
 0x447   : > { %v1403_v7 = vpack.c.bf16 %v1399_v6, %v1398_v3  ;;  %3145 = vmatpush3.bf16.msra.mxu0 %v3425_v9  ;;  %v3440_v9 = vld [vmem:[%s4274_s28 + $0xc4] ss:$16 sps:$4 sm:$0xff]  }
 0x448   : > { %3146 = vmatprep.subr.bf16.mxu0 %v3904_v5 }
 0x449   : > { %3139 = vmatmul.mubr.msk.bf16.vlgmr.msra.gmra.mxu1 %vm1311_vm3, %v1403_v7 }
 0x44a   : > { %2015 = vmatprep.mubr.bf16.mxu1 %v3903_v4  ;;  %1984 = vmatpush1.bf16.msra.mxu1 %v3432_v40  ;;  %v3486_v40 = vld [vmem:[%s4307_s18 + $0x30] sm:$0xff]  }
 0x44b   : > { %3147 = vmatpush3.bf16.msra.mxu0 %v3426_v10  ;;  %v3443_v10 = vld [vmem:[%s4274_s28 + $0xcc] ss:$16 sps:$4 sm:$0xff]   ;;  %1985 = vmatprep.subr.bf16.mxu1 %v3440_v9  ;;  %v3498_v9 = vld [vmem:[%s4307_s18 + $0x18] sm:$0xff]  }
 0x44c   : > { %3148 = vmatprep.subr.bf16.mxu0 %v3904_v5 }
 0x44f   : > { %3149 = vmatpush3.bf16.msra.mxu0 %v3427_v16  ;;  %v3444_v16 = vld [vmem:[%s4274_s28 + $0xa0] ss:$16 sps:$4 sm:$0xff]  }
 0x450   : > { %3150 = vmatprep.subr.bf16.mxu0 %v3904_v5 }
 0x453   : > { %3151 = vmatpush3.bf16.msra.mxu0 %v3428_v17  ;;  %v3447_v17 = vld [vmem:[%s4274_s28 + $0xa8] ss:$16 sps:$4 sm:$0xff]  }
 0x454   : > { %3152 = vmatprep.subr.bf16.mxu0 %v3904_v5 }
 0x457   : > { %3153 = vmatpush3.bf16.msra.mxu0 %v3429_v20  ;;  %v3453_v20 = vld [vmem:[%s4274_s28 + $0x88] ss:$16 sps:$4 sm:$0xff]  }
 0x458   : > { %3154 = vmatprep.subr.bf16.mxu0 %v3904_v5 }
 0x45b   : > { %3155 = vmatpush3.bf16.msra.mxu0 %v3430_v23  ;;  %v3461_v23 = vld [vmem:[%s4274_s28 + $0x6c] ss:$16 sps:$4 sm:$0xff]  }
 0x45c   : > { %3156 = vmatprep.subr.bf16.mxu0 %v3904_v5 }
 0x45f   : > { %3157 = vmatpush3.bf16.msra.mxu0 %v3431_v28  ;;  %v3464_v28 = vld [vmem:[%s4274_s28 + $0x44] ss:$16 sps:$4 sm:$0xff]  }
 0x460   : > { %2026 = vmatprep.subr.bf16.mxu0 %v3437_v0  ;;  %v3489_v0 = vld [vmem:[%s4307_s18 + $0xe8] sm:$0xff]  }
 0x49d   : > { %v1441_v12 = vpop.f32.mrf.mxu0 }
 0x49f   : > { %v3122_v13 = vpop.f32.mrf.mxu0 }
 0x4a0   : > { %v3441_v13 = vld [vmem:[%s4274_s28 + $0xc8] ss:$16 sps:$4 sm:$0xff]  }
 0x4a1   : > { %v1444_v14 = vpop.f32.mrf.mxu0 }
 0x4a3   : > { %v3123_v15 = vpop.f32.mrf.mxu0 }
 0x4a4   : > { %v3449_v15 = vld [vmem:[%s4274_s28 + $0xac] ss:$16 sps:$4 sm:$0xff]  }
 0x4f9   : > { %v1485_v18 = vpop.f32.mrf.mxu1 }
 0x4fb   : > { %v3128_v19 = vpop.f32.mrf.mxu1 }
 0x4fc   : > { %v3452_v19 = vld [vmem:[%s4274_s28 + $0x84] ss:$16 sps:$4 sm:$0xff]  }
 0x4fd   : > { %v1488_v21 = vpop.f32.mrf.mxu1 }
 0x4fe   : > { %v3377_v22 = vpack.i.bf16 %v1488_v21, %v1485_v18  ;;  %v3450_v18 = vld [vmem:[%s4274_s28 + $0x80] ss:$16 sps:$4 sm:$0xff]   ;;  %v3455_v21 = vld [vmem:[%s4274_s28 + $0x8c] ss:$16 sps:$4 sm:$0xff]  }
 0x4ff   : > { %v3129_v24 = vpop.f32.mrf.mxu1 }
 0x500   : > { %3378 = vrot.lane.b32.xlu1 %v3377_v22, %s3908_s29  ;;  %v3458_v22 = vld [vmem:[%s4274_s28 + $0x64] ss:$16 sps:$4 sm:$0xff]   ;;  %v3456_v24 = vld [vmem:[%s4274_s28 + $0x60] ss:$16 sps:$4 sm:$0xff]  }
 0x502   : > { %v1529_v27 = vpop.f32.mrf.mxu0 }
 0x504   : > { %v3134_v29 = vpop.f32.mrf.mxu0 }
 0x505   : > { %v3467_v29 = vld [vmem:[%s4274_s28 + $0x4c] ss:$16 sps:$4 sm:$0xff]  }
 0x506   : > { %v1532_v30 = vpop.f32.mrf.mxu0 }
 0x507   : > { %v3382_v31 = vpack.i.bf16 %v1532_v30, %v1529_v27  ;;  %v3459_v27 = vld [vmem:[%s4274_s28 + $0x68] ss:$16 sps:$4 sm:$0xff]   ;;  %v3462_v30 = vld [vmem:[%s4274_s28 + $0x40] ss:$16 sps:$4 sm:$0xff]  }
 0x508   : > { %v3135_v32 = vpop.f32.mrf.mxu0 }
 0x509   : > { %3383 = vrot.lane.b32.xlu0 %v3382_v31, %s3906_s2  ;;  %v1573_v33 = vpop.f32.mrf.mxu1  ;;  %v3465_v31 = vld [vmem:[%s4274_s28 + $0x48] ss:$16 sps:$4 sm:$0xff]   ;;  %v3470_v32 = vld [vmem:[%s4274_s28 + $0x24] ss:$16 sps:$4 sm:$0xff]  }
 0x50b   : > { %v3140_v34 = vpop.f32.mrf.mxu1 }
 0x50c   : > { %v3468_v34 = vld [vmem:[%s4274_s28 + $0x20] ss:$16 sps:$4 sm:$0xff]  }
 0x50d   : > { %v1576_v35 = vpop.f32.mrf.mxu1 }
 0x50e   : > { %v3387_v36 = vpack.i.bf16 %v1576_v35, %v1573_v33  ;;  %v3473_v33 = vld [vmem:[%s4274_s28 + $0x2c] ss:$16 sps:$4 sm:$0xff]   ;;  %v3471_v35 = vld [vmem:[%s4274_s28 + $0x28] ss:$16 sps:$4 sm:$0xff]  }
 0x50f   : > { %v3141_v37 = vpop.f32.mrf.mxu1 }
 0x510   : > { %3388 = vrot.lane.b32.xlu1 %v3387_v36, %s3907_s26  ;;  %v3476_v36 = vld [vmem:[%s4274_s28 + $0x4] ss:$16 sps:$4 sm:$0xff]   ;;  %v3479_v37 = vld [vmem:[%s4274_s28 + $0xc] ss:$16 sps:$4 sm:$0xff]  }
 0x572   : > { %v3379_v38 = vpop.permute.xlu1 %3378 }
 0x573   : > { %v3381_v41 = vunpack.i.h.bf16 %v3379_v38  ;;  %v3380_v43 = vunpack.i.l.bf16 %v3379_v38  ;;  %v3474_v38 = vld [vmem:[%s4274_s28] ss:$16 sps:$4 sm:$0xff]  }
 0x575   : > { %v1605_v46 = vsel %vm1103_vm1, %v1444_v14, %v3381_v41  ;;  %v1604_v47 = vsel %vm1103_vm1, %v1441_v12, %v3380_v43  ;;  %v3438_v12 = vld [vmem:[%s4274_s28 + $0xc0] ss:$16 sps:$4 sm:$0xff]   ;;  %v3446_v14 = vld [vmem:[%s4274_s28 + $0xa4] ss:$16 sps:$4 sm:$0xff]  }
 0x576   : > { %1986 = vmatpush1.bf16.msra.mxu1 %v3438_v12  ;;  %v3480_v41 = vld [vmem:[%s4307_s18 + $0x78] sm:$0xff]   ;;  %v3500_v12 = vld [vmem:[%s4307_s18 + $0x50] sm:$0xff]  }
 0x577   : > { %1987 = vmatprep.subr.bf16.mxu1 %v3446_v14  ;;  %v3481_v43 = vld [vmem:[%s4307_s18 + $0xf8] sm:$0xff]   ;;  %v3502_v14 = vld [vmem:[%s4307_s18 + $0x10] sm:$0xff]  }
 0x57a   : > { %1988 = vmatpush1.bf16.msra.mxu1 %v3444_v16  ;;  %v3504_v16 = vld [vmem:[%s4307_s18 + $0x48] sm:$0xff]  }
 0x57b   : > { %v3384_v39 = vpop.permute.xlu0 %3383  ;;  %1989 = vmatprep.subr.bf16.mxu1 %v3452_v19  ;;  %v3507_v19 = vld [vmem:[%s4307_s18 + $0x88] sm:$0xff]  }
 0x57c   : > { %v3386_v5 = vunpack.i.h.bf16 %v3384_v39  ;;  %v3385_v44 = vunpack.i.l.bf16 %v3384_v39  ;;  %v3477_v39 = vld [vmem:[%s4274_s28 + $0x8] ss:$16 sps:$4 sm:$0xff]  }
 0x57e   : > { %v1607_v50 = vsel %vm1606_vm5, %v1604_v47, %v3385_v44  ;;  %v1608_v51 = vsel %vm1606_vm5, %v1605_v46, %v3386_v5  ;;  %1990 = vmatpush1.bf16.msra.mxu1 %v3450_v18  ;;  %v3506_v18 = vld [vmem:[%s4307_s18 + $0x8] sm:$0xff]  }
 0x57f   : > { %1991 = vmatprep.subr.bf16.mxu1 %v3458_v22  ;;  %v3510_v22 = vld [vmem:[%s4307_s18] sm:$0xff]  }
 0x582   : > { %v3389_v45 = vpop.permute.xlu1 %3388  ;;  %1992 = vmatpush1.bf16.msra.mxu1 %v3456_v24  ;;  %v1809_v24 = vsub.s32 1, %v4404_v11 }
 0x583   : > { %v3391_v48 = vunpack.i.h.bf16 %v3389_v45  ;;  %v3390_v49 = vunpack.i.l.bf16 %v3389_v45  ;;  %1993 = vmatprep.subr.bf16.mxu1 %v3464_v28  ;;  %v1805_v28 = vsub.s32 0, %v4404_v11 }
 0x585   : > { %v1611_v52 = vsel %vm1609_vm6, %v1608_v51, %v3391_v48  ;;  %v1610_v53 = vsel %vm1609_vm6, %v1607_v50, %v3390_v49  ;;  %v2906_v51 = vld [vmem:[%s4807_s3] ss:$0 sm:$0xff] }
 0x586   : > { %v1612_v54 = vpack.c.bf16 %v1611_v52, %v1610_v53  ;;  %1994 = vmatpush1.bf16.msra.mxu1 %v3462_v30  ;;  %v1801_v30 = vld [vmem:[%s4276_s25] sm:$0xf] }
 0x587   : > { %1995 = vmatprep.subr.bf16.mxu1 %v3470_v32 }
 0x588   : > { %3159 = vmatmul.mubr.bf16.vlgmr.msra.gmra.mxu0 %v1612_v54 }
 0x589   : > { %2058 = vmatprep.mubr.bf16.mxu0 %v3903_v4  ;;  %v3435_v4 = vld [vmem:[%s4274_s28 + $0xe8] ss:$16 sps:$4 sm:$0xff]  }
 0x58a   : > { %2027 = vmatpush1.bf16.msra.mxu0 %v3435_v4  ;;  %1996 = vmatpush1.bf16.msra.mxu1 %v3468_v34  ;;  %v3488_v4 = vld [vmem:[%s4307_s18 + $0x68] sm:$0xff]  }
 0x58b   : > { %2028 = vmatprep.subr.bf16.mxu0 %v3443_v10  ;;  %1997 = vmatprep.subr.bf16.mxu1 %v3476_v36  ;;  %v3499_v10 = vld [vmem:[%s4307_s18 + $0x98] sm:$0xff]  }
 0x58e   : > { %2029 = vmatpush1.bf16.msra.mxu0 %v3441_v13  ;;  %1998 = vmatpush1.bf16.msra.mxu1 %v3474_v38  ;;  %v3501_v13 = vld [vmem:[%s4307_s18 + $0xd0] sm:$0xff]  }
 0x58f   : > { %2030 = vmatprep.subr.bf16.mxu0 %v3449_v15  ;;  %3030 = vmatprep.subr.bf16.mxu1 %v3480_v41  ;;  %v3503_v15 = vld [vmem:[%s4307_s18 + $0x90] sm:$0xff]  }
 0x592   : > { %2031 = vmatpush1.bf16.msra.mxu0 %v3447_v17  ;;  %v3505_v17 = vld [vmem:[%s4307_s18 + $0xc8] sm:$0xff]  }
 0x593   : > { %2032 = vmatprep.subr.bf16.mxu0 %v3455_v21  ;;  %v3509_v21 = vld [vmem:[%s4307_s18 + $0xc0] sm:$0xff]  }
 0x596   : > { %2033 = vmatpush1.bf16.msra.mxu0 %v3453_v20  ;;  %v3508_v20 = vld [vmem:[%s4307_s18 + $0x40] sm:$0xff]  }
 0x597   : > { %2034 = vmatprep.subr.bf16.mxu0 %v3461_v23  ;;  %v3511_v23 = vld [vmem:[%s4307_s18 + $0x80] sm:$0xff]  }
 0x59a   : > { %2035 = vmatpush1.bf16.msra.mxu0 %v3459_v27  ;;  %v1817_v27 = vsub.s32 3, %v4404_v11 }
 0x59b   : > { %2036 = vmatprep.subr.bf16.mxu0 %v3467_v29  ;;  %v1813_v29 = vsub.s32 2, %v4404_v11 }
 0x59c   : > { %v1818_v34 = vrot.slane %v1801_v30, %v1817_v27 }
 0x59d   : > { %v1814_v36 = vrot.slane %v1801_v30, %v1813_v29 }
 0x59e   : > { %2037 = vmatpush1.bf16.msra.mxu0 %v3465_v31 }
 0x59f   : > { %2038 = vmatprep.subr.bf16.mxu0 %v3473_v33  ;;  %v1810_v33 = vrot.slane %v1801_v30, %v1809_v24 }
 0x5a2   : > { %2039 = vmatpush1.bf16.msra.mxu0 %v3471_v35  ;;  %v1806_v35 = vrot.slane %v1801_v30, %v1805_v28 }
 0x5a3   : > { %2040 = vmatprep.subr.bf16.mxu0 %v3479_v37 }
 0x5a6   : > { %2041 = vmatpush1.bf16.msra.mxu0 %v3477_v39 }
 0x5a7   : > { %3052 = vmatprep.subr.bf16.mxu0 %v3481_v43 }
 0x648   : > { %v1718_v56 = vpop.f32.mrf.mxu0 }
 0x649   : > { %v1719_v57 = vadd.f32 %v2897_v55, %v1718_v56 }
 0x64a   : > { %v3160_v58 = vpop.f32.mrf.mxu0 }
 0x64b   : > { %v1725_v59 = vadd.f32 %v1719_v57, %v4349_v25 }
 0x64c   : > { %v1721_v60 = vpop.f32.mrf.mxu0 }
 0x64d   : > { %v1722_v61 = vadd.f32 %v2897_v55, %v1721_v60  ;;  %1729 = vadd.xlane.f32.xlu0 %v1725_v59  ;;  %v2907_v55 = vld [vmem:[%s765_s27] ss:$0 sm:$0xff]  ;;  %v3483_v60 = vld [vmem:[%s4307_s18 + $0xb8] sm:$0xff]  }
 0x64e   : > { %v3161_v62 = vpop.f32.mrf.mxu0 }
 0x64f   : > { %v1726_v63 = vadd.f32 %v1722_v61, %v4352_v26  ;;  %v3484_v62 = vld [vmem:[%s4307_s18 + $0x70] sm:$0xff]  }
 0x651   : > { %1731 = vadd.xlane.f32.xlu1 %v1726_v63 }
 0x6d6   : > { %v1730_v25 = vpop.xlane.xlu0 %1729 }
 0x6d7   : > { %v1734_v1 = vmul.f32 0.0078125, %v1730_v25  ;;  %v3490_v25 = vld [vmem:[%s4307_s18 + $0x28] sm:$0xff]  }
 0x6d9   : > { %v4490_v2 = vsub.f32 %v1725_v59, %v1734_v1  ;;  %v3482_v59 = vld [vmem:[%s4307_s18 + $0x38] sm:$0xff]   ;;  %v3491_v1 = vld [vmem:[%s4307_s18 + $0xa8] sm:$0xff]  }
 0x6da   : > { %v1732_v3 = vpop.xlane.xlu1 %1731 }
 0x6db   : > { %v1735_v26 = vmul.f32 0.0078125, %v1732_v3  ;;  %v1738_v6 = vmul.f32 %v4490_v2, %v4490_v2  ;;  %v3493_v3 = vld [vmem:[%s4307_s18 + $0xe0] sm:$0xff]  }
 0x6dd   : > { %v4494_v7 = vsub.f32 %v1726_v63, %v1735_v26  ;;  %1740 = vadd.xlane.f32.xlu0 %v1738_v6  ;;  %v3485_v63 = vld [vmem:[%s4307_s18 + $0xf0] sm:$0xff]   ;;  %v3494_v26 = vld [vmem:[%s4307_s18 + $0x20] sm:$0xff]  }
 0x6de   : > { %v3495_v6 = vld [vmem:[%s4307_s18 + $0xa0] sm:$0xff]  }
 0x6df   : > { %v1739_v8 = vmul.f32 %v4494_v7, %v4494_v7 }
 0x6e1   : > { %1742 = vadd.xlane.f32.xlu0 %v1739_v8  ;;  %v3497_v8 = vld [vmem:[%s4307_s18 + $0xd8] sm:$0xff]  }
 0x766   : > { %v1741_v5 = vpop.xlane.xlu0 %1740 }
 0x767   : > { %v1744_v44 = vmul.f32 0.0078125, %v1741_v5 }
 0x769   : > { %v1746_v45 = vadd.f32 1e-05, %v1744_v44 }
 0x76a   : > { %v1743_v46 = vpop.xlane.xlu0 %1742 }
 0x76b   : > { %3544 = vrsqrt.f32 %v1746_v45  ;;  %v1745_v47 = vmul.f32 0.0078125, %v1743_v46 }
 0x76d   : > { %v1747_v48 = vadd.f32 1e-05, %v1745_v47 }
 0x76f   : > { %3546 = vrsqrt.f32 %v1747_v48 }
 0x778   : > { %v3545_v49 = vpop.eup %3544 }
 0x779   : > { %v1750_v50 = vmul.f32 %v3545_v49, %v4490_v2  ;;  %v3492_v2 = vld [vmem:[%s4307_s18 + $0x60] sm:$0xff]  }
 0x77b   : > { %v1758_v54 = vmul.f32 %v2906_v51, %v1750_v50 }
 0x77c   : > { %v3547_v52 = vpop.eup %3546 }
 0x77d   : > { %v1751_v53 = vmul.f32 %v3547_v52, %v4494_v7  ;;  %v4537_v57 = vadd.f32 %v2907_v55, %v1758_v54  ;;  %v3496_v7 = vld [vmem:[%s4307_s18 + $0x58] sm:$0xff]  }
 0x77f   : > { %v1759_v56 = vmul.f32 %v2906_v51, %v1751_v53 }
 0x781   : > { %v4539_v58 = vadd.f32 %v2907_v55, %v1759_v56 }
 0x783   : > { %v1768_v61 = vpack.c.bf16 %v4539_v58, %v4537_v57 }
 0x785   : > { %2016 = vmatmul.mubr.bf16.vlgmr.msra.gmra.mxu1 %v1768_v61  ;;  %2059 = vmatmul.mubr.bf16.vlgmr.msra.gmra.mxu0 %v1768_v61 }
 0x786   : > { %3031 = vmatpush3.bf16.msra.mxu1 %v3482_v59  ;;  %3053 = vmatpush3.bf16.msra.mxu0 %v3483_v60 }
 0x787   : > { %3032 = vmatprep.subr.bf16.mxu1 %v3484_v62  ;;  %3054 = vmatprep.subr.bf16.mxu0 %v3485_v63 }
 0x78a   : > { %3033 = vmatpush3.bf16.msra.mxu1 %v3486_v40  ;;  %3055 = vmatpush3.bf16.msra.mxu0 %v3487_v42 }
 0x78b   : > { %3034 = vmatprep.subr.bf16.mxu1 %v3488_v4  ;;  %3056 = vmatprep.subr.bf16.mxu0 %v3489_v0  ;;  %v2940_v0 = vld [vmem:[%s768_s24] ss:$0 sm:$0xff] }
 0x78e   : > { %3035 = vmatpush3.bf16.msra.mxu1 %v3490_v25  ;;  %3057 = vmatpush3.bf16.msra.mxu0 %v3491_v1 }
 0x78f   : > { %3036 = vmatprep.subr.bf16.mxu1 %v3492_v2  ;;  %3058 = vmatprep.subr.bf16.mxu0 %v3493_v3 }
 0x792   : > { %3037 = vmatpush3.bf16.msra.mxu1 %v3494_v26  ;;  %3059 = vmatpush3.bf16.msra.mxu0 %v3495_v6 }
 0x793   : > { %3038 = vmatprep.subr.bf16.mxu1 %v3496_v7  ;;  %3060 = vmatprep.subr.bf16.mxu0 %v3497_v8 }
 0x796   : > { %3039 = vmatpush3.bf16.msra.mxu1 %v3498_v9  ;;  %3061 = vmatpush3.bf16.msra.mxu0 %v3499_v10 }
 0x797   : > { %3040 = vmatprep.subr.bf16.mxu1 %v3500_v12  ;;  %3062 = vmatprep.subr.bf16.mxu0 %v3501_v13 }
 0x79a   : > { %3041 = vmatpush3.bf16.msra.mxu1 %v3502_v14  ;;  %3063 = vmatpush3.bf16.msra.mxu0 %v3503_v15 }
 0x79b   : > { %3042 = vmatprep.subr.bf16.mxu1 %v3504_v16  ;;  %3064 = vmatprep.subr.bf16.mxu0 %v3505_v17 }
 0x79e   : > { %3043 = vmatpush3.bf16.msra.mxu1 %v3506_v18  ;;  %3065 = vmatpush3.bf16.msra.mxu0 %v3507_v19 }
 0x79f   : > { %3044 = vmatprep.subr.bf16.mxu1 %v3508_v20  ;;  %3066 = vmatprep.subr.bf16.mxu0 %v3509_v21 }
 0x7a2   : > { %3045 = vmatpush3.bf16.msra.mxu1 %v3510_v22  ;;  %3067 = vmatpush3.bf16.msra.mxu0 %v3511_v23 }
 0x845   : > { %v2017_v31 = vpop.f32.mrf.mxu1  ;;  %v2060_v32 = vpop.f32.mrf.mxu0 }
 0x846   : > { %v2018_v46 = vadd.f32 %v2017_v31, %v1806_v35  ;;  %v2061_v47 = vadd.f32 %v2060_v32, %v1814_v36 }
 0x847   : > { %v2019_v37 = vpop.f32.mrf.mxu1  ;;  %v2062_v38 = vpop.f32.mrf.mxu0 }
 0x848   : > { %v2020_v43 = vadd.f32 %v2019_v37, %v1810_v33  ;;  %v2063_v5 = vadd.f32 %v2062_v38, %v1818_v34  ;;  %v2069_v59 = vmax.f32 %v2018_v46, 0.0  ;;  %v2071_v60 = vmax.f32 %v2061_v47, 0.0 }
 0x849   : > { %v2021_v39 = vpop.f32.mrf.mxu1  ;;  %v2064_v41 = vpop.f32.mrf.mxu0 }
 0x84a   : > { %v2022_v44 = vadd.f32 %v2021_v39, %v1806_v35  ;;  %v2065_v45 = vadd.f32 %v2064_v41, %v1814_v36  ;;  %v2070_v53 = vmax.f32 %v2020_v43, 0.0  ;;  %v2072_v54 = vmax.f32 %v2063_v5, 0.0  ;;  %v2974_v35 = vld [vmem:[%s774_s13] ss:$0 sm:$0xff] }
 0x84b   : > { %v2023_v48 = vpop.f32.mrf.mxu1  ;;  %v2066_v49 = vpop.f32.mrf.mxu0  ;;  %v3552_v41 = vld [vmem:[%s4311_s9] sm:$0xff] }
 0x84c   : > { %v2024_v11 = vadd.f32 %v2023_v48, %v1810_v33  ;;  %v2067_v50 = vadd.f32 %v2066_v49, %v1818_v34  ;;  %v2073_v51 = vmax.f32 %v2022_v44, 0.0  ;;  %v2075_v52 = vmax.f32 %v2065_v45, 0.0  ;;  %v2973_v33 = vld [vmem:[%s771_s16] ss:$0 sm:$0xff]  ;;  %v3553_v45 = vld [vmem:[%s4311_s9 + $0x8] sm:$0xff] }
 0x84e   : > { %v2074_v55 = vmax.f32 %v2024_v11, 0.0  ;;  %v2076_v56 = vmax.f32 %v2067_v50, 0.0  ;;  %v2077_v63 = vpack.c.bf16 %v2073_v51, %v2069_v59  ;;  %v2079_v40 = vpack.c.bf16 %v2075_v52, %v2071_v60 }
 0x850   : > { %v2078_v61 = vpack.c.bf16 %v2074_v55, %v2070_v53  ;;  %v2080_v62 = vpack.c.bf16 %v2076_v56, %v2072_v54 }
 0x852   : > { %2376 = vmatprep.mubr.bf16.mxu1 %v2078_v61  ;;  %2417 = vmatprep.mubr.bf16.mxu0 %v2080_v62 }
 0x853   : > { %2377 = vmatmul.mubr.bf16.vlgmr.msra.gmra.mxu1 %v2077_v63  ;;  %2418 = vmatmul.mubr.bf16.vlgmr.msra.gmra.mxu0 %v2079_v40 }
 0x913   : > { %v3046_v42 = vpop.f32.mrf.mxu1  ;;  %v3068_v4 = vpop.f32.mrf.mxu0 }
 0x915   : > { %v3047_v25 = vpop.f32.mrf.mxu1  ;;  %v3069_v1 = vpop.f32.mrf.mxu0 }
 0x916   : > { %v3048_v2 = vadd.f32 %v3047_v25, %v3046_v42  ;;  %v3070_v7 = vadd.f32 %v3069_v1, %v3068_v4 }
 0x917   : > { %v3049_v3 = vpop.f32.mrf.mxu1  ;;  %v3071_v26 = vpop.f32.mrf.mxu0 }
 0x918   : > { %v2379_v6 = vadd.f32 %v3048_v2, %v2940_v0 }
 0x919   : > { %v3050_v8 = vpop.f32.mrf.mxu1  ;;  %v3072_v9 = vpop.f32.mrf.mxu0 }
 0x91a   : > { %v2420_v10 = vadd.f32 %v3070_v7, %v2379_v6  ;;  %v3051_v12 = vadd.f32 %v3050_v8, %v3049_v3  ;;  %v3073_v14 = vadd.f32 %v3072_v9, %v3071_v26 }
 0x91c   : > { %v2382_v13 = vadd.f32 %v3051_v12, %v2940_v0  ;;  %v2426_v15 = vadd.f32 %v2420_v10, %v4537_v57 }
 0x91e   : > { %v2423_v16 = vadd.f32 %v3073_v14, %v2382_v13  ;;  %2430 = vadd.xlane.f32.xlu1 %v2426_v15 }
 0x920   : > { %v2427_v17 = vadd.f32 %v2423_v16, %v4539_v58 }
 0x922   : > { %2432 = vadd.xlane.f32.xlu0 %v2427_v17 }
 0x9a7   : > { %v2431_v18 = vpop.xlane.xlu1 %2430 }
 0x9a8   : > { %v2434_v19 = vmul.f32 0.0078125, %v2431_v18 }
 0x9aa   : > { %v2436_v20 = vsub.f32 %v2426_v15, %v2434_v19 }
 0x9ab   : > { %v2433_v21 = vpop.xlane.xlu0 %2432 }
 0x9ac   : > { %v2435_v22 = vmul.f32 0.0078125, %v2433_v21  ;;  %v2438_v23 = vmul.f32 %v2436_v20, %v2436_v20 }
 0x9ae   : > { %v2437_v24 = vsub.f32 %v2427_v17, %v2435_v22  ;;  %2440 = vadd.xlane.f32.xlu1 %v2438_v23 }
 0x9b0   : > { %v2439_v27 = vmul.f32 %v2437_v24, %v2437_v24 }
 0x9b2   : > { %2442 = vadd.xlane.f32.xlu0 %v2439_v27 }
 0xa37   : > { %v2441_v28 = vpop.xlane.xlu1 %2440 }
 0xa38   : > { %v2444_v57 = vmul.f32 0.0078125, %v2441_v28 }
 0xa3a   : > { %v2446_v29 = vadd.f32 1e-05, %v2444_v57 }
 0xa3b   : > { %v2443_v30 = vpop.xlane.xlu0 %2442 }
 0xa3c   : > { %3548 = vrsqrt.f32 %v2446_v29  ;;  %v2445_v58 = vmul.f32 0.0078125, %v2443_v30 }
 0xa3e   : > { %v2447_v31 = vadd.f32 1e-05, %v2445_v58 }
 0xa40   : > { %3550 = vrsqrt.f32 %v2447_v31 }
 0xa49   : > { %v3549_v32 = vpop.eup %3548 }
 0xa4a   : > { %v2450_v34 = vmul.f32 %v3549_v32, %v2436_v20 }
 0xa4c   : > { %v2458_v36 = vmul.f32 %v2973_v33, %v2450_v34 }
 0xa4d   : > { %v3551_v37 = vpop.eup %3550 }
 0xa4e   : > { %v2466_v38 = vadd.f32 %v2974_v35, %v2458_v36  ;;  %v2451_v39 = vmul.f32 %v3551_v37, %v2437_v24 }
 0xa50   : > { %v2468_v43 = vadd.f32 %v3552_v41, %v2466_v38  ;;  %v2459_v5 = vmul.f32 %v2973_v33, %v2451_v39 }
 0xa52   : > { %2470 = vst [vmem:[%s4311_s9] sm:$0xff] %v2468_v43  ;;  %v2467_v44 = vadd.f32 %v2974_v35, %v2459_v5  ;;  %2474 = sbr.rel (%p2864_p7) target bundleno = 2648 (0xa58), region = 104 }
 0xa54   : > { %v2469_v46 = vadd.f32 %v3553_v45, %v2467_v44 }
 0xa56   : > { %2471 = vst [vmem:[%s4311_s9 + $0x8] sm:$0xff] %v2469_v46 }
 0xa57   : > { %2475 = vst [vmem:[%s4313_s11] sm:$0xff] %v2468_v43  ;;  %2476 = vst [vmem:[%s4313_s11 + $0x8] sm:$0xff] %v2469_v46 }
 0xa58 PF: > { %s4813_s16 = sld [smem:[#allocation30_spill]] }
 0xa5e   : > { %p2976_p0 = scmp.ne.s32.totalorder %s4813_s16, 1 }
 0xa60   : > { %2480 = sbr.rel (%p2976_p0) target bundleno = 2662 (0xa66), region = 108 }
 0xa65   : > { %2977 = vst [vmem:[%s4313_s11 + $0x10] sm:$0xff] %v2468_v43  ;;  %2978 = vst [vmem:[%s4313_s11 + $0x18] sm:$0xff] %v2469_v46 }
 0xa66 PF: > { %s4814_s8 = sld [smem:[#allocation30_spill]] }
 0xa6c   : > { %p2979_p11 = scmp.ne.s32.totalorder %s4814_s8, 2 }
 0xa6e   : > { %2487 = sbr.rel (%p2979_p11) target bundleno = 2676 (0xa74), region = 112 }
 0xa73   : > { %2980 = vst [vmem:[%s4313_s11 + $0x20] sm:$0xff] %v2468_v43  ;;  %2981 = vst [vmem:[%s4313_s11 + $0x28] sm:$0xff] %v2469_v46 }
 0xa74 PF: > { %s4815_s17 = sld [smem:[#allocation31_spill]]  ;;  %s2510_s21 = sshll.u32 %s4311_s9, 4  ;;  %s4618_s21 = int_to_ptr.vmem [resolvable:$true] %s2510_s21 }
 0xa75   : > { %s4816_s22 = sld [smem:[#allocation40_spill]]  ;;  %s2492_s0 = scalar_lea.sflag [#allocation4], %s4241_s10 }
 0xa76   : > { %s4817_s26 = sld [smem:[#allocation54_spill]]  ;;  %s3750_s23 = scalar_lea.vmem %s4618_s21, 256 }
 0xa77   : > { %p3751_p2 = scmp.ne.s32.totalorder %s4618_s21, %s3750_s23  ;;  %s3909_s7 = smov [#allocation14]  }
 0xa78   : > { %s3754_s3 = sshll.u32 %s3909_s7, 4  ;;  %s3755_s3 = int_to_ptr.vmem [resolvable:$false] %s3754_s3 }
 0xa79   : > { %s3756_s9 = scalar_lea.vmem %s3755_s3, 512  ;;  %p3757_p10 = scmp.lt.s32.totalorder %s4618_s21, %s3755_s3 }
 0xa7a   : > { %s2994_s24 = sshll.u32 %s4815_s17, 8  ;;  %p3758_p1 = scmp.lt.s32.totalorder %s3756_s9, %s3750_s23 }
 0xa7b   : > { %p4819_p4 = scmp.ne.s32.totalorder %s4816_s22, 0 }
 0xa7c   : > { %s4818_s12 = smov %s4817_s26  ;;  %s4616_s29 = scalar_lea.hbm %s4817_s26, %s2994_s24 }
 0xa7d   : > { %p3752_p3 = pnand %p3751_p2, %p4819_p4  ;;  %p3759_p13 = por %p3758_p1, %p3757_p10 }
 0xa7f   : > { %p3753_p8 = pneg %p3752_p3 }
 0xa81   : > { %p3760_p9 = pnand %p3759_p13, %p3753_p8 }
 0xa83   : > { %3763 = shalt.err (!%p3760_p9)
}
 0xa84   : > { %s3764_s1 = scalar_lea.hbm %s4616_s29, 256  ;;  %s3768_s18 = scalar_lea.hbm %s4818_s12, 512 }
 0xa85   : > { %p3765_p12 = scmp.ne.s32.totalorder %s4616_s29, %s3764_s1  ;;  %p3769_p7 = scmp.lt.s32.totalorder %s4616_s29, %s4818_s12 }
 0xa86   : > { %p3770_p0 = scmp.lt.s32.totalorder %s3768_s18, %s3764_s1 }
 0xa87   : > { %p3766_p6 = pnand %p3765_p12, %p4819_p4 }
 0xa88   : > { %p3771_p11 = por %p3770_p0, %p3769_p7 }
 0xa89   : > { %p3767_p5 = pneg %p3766_p6 }
 0xa8b   : > { %p3772_p2 = pnand %p3771_p11, %p3767_p5 }
 0xa8d   : > { %3775 = shalt.err (!%p3772_p2)
}
 0xa8e   : > { %s3910_s15 = smov 128   ;;  %s3911_s4 = smov 8  }
 0xa8f   : > { %3180 = dma.vmem_to_hbm [thread:$0]  (%p4819_p4), %s4618_s21, 256, %s4616_s29, %s2492_s0, %s3910_s15, %s3910_s15, %s3911_s4  }
 0xa90   : > { %s2497_s20 = scalar_lea.sflag [#allocation16], %s4241_s10 }
 0xa91   : > { %s4820_s27 = sld [smem:[#allocation55_spill]]  ;;  %s2536_s16 = sshll.u32 %s4313_s11, 4  ;;  %s2537_s16 = int_to_ptr.vmem [resolvable:$true] %s2536_s16 }
 0xa92   : > { %s3912_s8 = smov 256   ;;  %s3913_s10 = smov 512  }
 0xa93   : > { %3181 = sst [smem:[#allocation18]] (%p4819_p4), %s3912_s8  ;;  %s3914_s17 = smov 2  }
 0xa94   : > { %3182 = sst [smem:[#allocation18 + $0x1]] (%p4819_p4), %s3913_s10  ;;  %s3915_s21 = smov 128  }
 0xa95   : > { %3183 = sst [smem:[#allocation18 + $0x2]] (%p4819_p4), %s3914_s17  ;;  %s3916_s13 = smov 8  }
 0xa96   : > { %3184 = sst [smem:[#allocation18 + $0x3]] (%p4819_p4), %s3915_s21  ;;  %s3918_s11 = smov 0  }
 0xa97   : > { %s2525_s14 = scalar_lea.hbm %s4820_s27, %s2994_s24  ;;  %3185 = sst [smem:[#allocation18 + $0x4]] (%p4819_p4), %s3915_s21 }
 0xa98   : > { %3186 = sst [smem:[#allocation18 + $0x5]] (%p4819_p4), %s3916_s13  ;;  %s3917_s24 = smov 131072  }
 0xa99   : > { %3187 = dma.general (%p4819_p4), %s2537_s16, 768, %s2525_s14, %s2497_s20, %s3917_s24, [#allocation18], %s3918_s11, 0  }
 0xa9a PF: > { %s4821_s2 = sld [smem:[#allocation34_spill]] }
 0xa9b   : > { %s4822_s26 = sld [smem:[#allocation27_spill]] }
 0xa9c   : > { %s4823_s29 = sld [smem:[#allocation41_spill]] }
 0xaa0   : > { %p3220_p3 = scmp.ge.s32.totalorder %s4821_s2, 2 }
 0xaa1   : > { %s2564_s0 = sand.u32 1, %s4822_s26  }
 0xaa2   : > { %p4824_p8 = scmp.ne.s32.totalorder %s4823_s29, 0  ;;  %s2565_s23 = scalar_lea.sflag [#allocation4], %s2564_s0 }
 0xaa4   : > { %p3213_p10 = pnand %p3220_p3, %p4824_p8 }
 0xaa6   : > { %p3214_p1 = pneg %p3213_p10 }
 0xaa8   : > { %3837 = dma.done.wait (%p3214_p1), %s2565_s23, 256  }
 0xaa9   : > { %3839 = vsyncadd (%p3214_p1), %s2565_s23, 4294967040  ;;  %s2574_s7 = scalar_lea.sflag [#allocation16], %s2564_s0 }
 0xaaa   : > { %3841 = dma.done.wait (%p3214_p1), %s2574_s7, 768  }
 0xaab   : > { %3843 = vsyncadd (%p3214_p1), %s2574_s7, 4294966528  ;;  %s42_s18 = sadd.s32 1, %s4821_s2   ;;  %s4825_s25 = sld [smem:[#allocation25_spill]] }
 0xaac   : > { %p39_p13 = scmp.ge.s32.totalorder %s42_s18, 10   ;;  %s4826_s26 = sld [smem:[#allocation26_spill]] }
 0xaad   : > { %s4827_s27 = sld [smem:[#allocation38_spill]] }
 0xaae   : > { %s4828_s28 = sld [smem:[#allocation28_spill]] }
 0xaaf   : > { %s4829_s29 = sld [smem:[#allocation29_spill]] }
 0xab0   : > { %s4830_s30 = sld [smem:[#allocation39_spill]]  ;;  %41 = sbr.rel (!%p39_p13) target bundleno = 32 (0x20), region = 240 }
 0xab1   : > { %s4831_s14 = sld [smem:[#allocation32_spill]] }
 0xab2   : > { %s4832_s15 = sld [smem:[#allocation33_spill]] }
 0xab3   : > { %s4833_s16 = sld [smem:[#allocation36_spill]] }
 0xab4   : > { %s4834_s17 = sld [smem:[#allocation37_spill]] }
 0xab5   :  { %2579 = vsyncpa [#allocation3], 1 }
 0xab6   :  { %2581 = vsyncpa [#allocation3 + $0x1], 1 }
 0xab7   :  { %2582 = vsyncpa [#allocation6], 1 }
 0xab8   :  { %2584 = vsyncpa [#allocation6 + $0x1], 1 }
 0xab9   :  { %2585 = vsyncpa [#allocation9], 1 }
 0xaba   :  { %2587 = vsyncpa [#allocation9 + $0x1], 1 }
 0xabb   :  { %2588 = vsyncpa [#allocation12], 1 }
 0xabc   :  { %2590 = vsyncpa [#allocation12 + $0x1], 1 }
 0xabd   :  { %2591 = vsyncpa [#allocation4], 1 }
 0xabe   :  { %2593 = vsyncpa [#allocation4 + $0x1], 1 }
 0xabf   :  { %2594 = vsyncpa [#allocation16], 1 }
 0xac0   :  { %2596 = vsyncpa [#allocation16 + $0x1], 1 }

</bundles_post_ra>
